<compile_context>
chip_gen: v6e
topology: v6e:2x2x1
jax: 0.10.0
libtpu: 0.0.40
codegen_flags: <defaults>
</compile_context>

<pallas_src>
import numpy as np
import jax
import jax.numpy as jnp
from jax import lax
from jax.experimental import pallas as pl
from jax.experimental.pallas import tpu as pltpu

NORM_CHANNELS = 8
GN_EPS = 1e-5


def build_sinc_filter(kernel_size, cutoff):
    # Identical to the reference numpy implementation (including its quirky
    # constant 0.08*cos(4*pi*M) Blackman term -- kept to match the module).
    assert kernel_size % 2 == 1
    M = kernel_size - 1
    filt = np.zeros(kernel_size, dtype=np.float32)
    for i in range(kernel_size):
        if i == M // 2:
            filt[i] = 2 * np.pi * cutoff
        else:
            filt[i] = (np.sin(2 * np.pi * cutoff * (i - M // 2)) / (i - M // 2)
                       * (0.42 - 0.5 * np.cos(2 * np.pi * i / M)
                          + 0.08 * np.cos(4 * np.pi * M)))
    filt = filt / np.sum(filt)
    return filt


def build_downsample_matrix(T, filt, stride):
    """Fold reflect-pad + depthwise sinc conv + stride-`stride` subsample into a
    single (T, T_out) matrix D so that out[c] = y[c] @ D for every channel.
    Valid because ResampleSinc (trainable=False) uses the SAME fixed filter for
    all channels."""
    K = filt.shape[0]
    num_pad = (K - 1) // 2
    Tp = T + 2 * num_pad
    T_out = (Tp - K) // stride + 1

    def reflect(i):  # torch F.pad(..., mode='reflect') index map into [0, T)
        if i < 0:
            return -i
        if i >= T:
            return 2 * (T - 1) - i
        return i

    D = np.zeros((T, T_out), dtype=np.float32)
    for o in range(T_out):
        for k in range(K):
            D[reflect(o * stride + k - num_pad), o] += filt[k]
    return D


# ---------------------------------------------------------------------------
# Fused kernel: (pre convs) -> shortcut -> (post convs) -> sinc downsample
# ---------------------------------------------------------------------------
def _make_fused_kernel(*, C_MAX, K, T, L, depth, n_shortcut):
    PAD = (K - 1) // 2
    G = C_MAX // NORM_CHANNELS

    def kernel(x_ref, w_ref, p_ref, d_ref, out_ref, sc_ref):
        # x_ref : (1, C_in, T)            one batch element
        # w_ref : (L, C_MAX, K*C_MAX)     im2col weights, channels zero-padded
        # p_ref : (L, C_MAX, 3)           [:, :, 0]=bias, 1=gamma, 2=beta (0-padded)
        # d_ref : (T, T_out)              folded reflect-pad+sinc+stride-2 matrix
        # out_ref: (1, C_MAX, T_out)      downsampled output
        # sc_ref : (1, n_shortcut, T)     shortcut output
        x0 = x_ref[0].astype(jnp.float32)                       # (C_in, T)
        c_in = x0.shape[0]
        if c_in < C_MAX:                                        # zero-pad channels
            y = jnp.concatenate(
                [x0, jnp.zeros((C_MAX - c_in, T), jnp.float32)], axis=0)
        else:
            y = x0

        zpad = jnp.zeros((C_MAX, PAD), jnp.float32)
        for l in range(L):                                      # static unroll (L=4)
            # ---- Conv1d (stride 1, 'same' zero pad) as a single MXU matmul ----
            xp = jnp.concatenate([zpad, y, zpad], axis=1)       # (C_MAX, T+2*PAD)
            xim = jnp.concatenate([xp[:, k:k + T] for k in range(K)], axis=0)
            acc = jnp.dot(w_ref[l], xim,
                          preferred_element_type=jnp.float32)   # (C_MAX, T)
            acc = acc + p_ref[l, :, 0:1]                        # bias

            # ---- GroupNorm (groups of 8 channels) + affine + ReLU -------------
            # Padded channels have zero weights/bias/gamma/beta and sit in their
            # own groups (C_out is always a multiple of 8), so they stay exactly 0.
            segs = []
            for g in range(G):                                  # G <= 2, static
                seg = acc[g * NORM_CHANNELS:(g + 1) * NORM_CHANNELS, :]
                mean = jnp.mean(seg)
                var = jnp.mean((seg - mean) ** 2)               # biased (torch GN)
                segs.append((seg - mean) * lax.rsqrt(var + GN_EPS))
            normed = segs[0] if G == 1 else jnp.concatenate(segs, axis=0)
            y = jnp.maximum(normed * p_ref[l, :, 1:2] + p_ref[l, :, 2:3], 0.0)

            if l == depth - 1:                                  # shortcut tap
                sc_ref[0] = y[0:n_shortcut, :].astype(sc_ref.dtype)

        # ---- downconv: reflect pad + sinc depthwise + stride-2, one matmul ----
        out_ref[0] = jnp.dot(y, d_ref[...],
                             preferred_element_type=jnp.float32).astype(out_ref.dtype)

    return kernel


def downsampling_block_forward(x, W_packed, P_packed, D, *, n_shortcut, depth):
    """Fused DownsamplingBlock forward. Returns (out, shortcut)."""
    B, C_in, T = x.shape
    L, C_MAX, KC = W_packed.shape
    K = KC // C_MAX
    T_out = D.shape[1]
    assert L == 2 * depth and C_MAX % NORM_CHANNELS == 0

    kernel = _make_fused_kernel(C_MAX=C_MAX, K=K, T=T, L=L, depth=depth,
                                n_shortcut=n_shortcut)

    out, shortcut = pl.pallas_call(
        kernel,
        out_shape=(jax.ShapeDtypeStruct((B, C_MAX, T_out), x.dtype),
                   jax.ShapeDtypeStruct((B, n_shortcut, T), x.dtype)),
        grid=(B,),
        in_specs=[
            pl.BlockSpec((1, C_in, T), lambda b: (b, 0, 0)),
            pl.BlockSpec((L, C_MAX, KC), lambda b: (0, 0, 0)),
            pl.BlockSpec((L, C_MAX, 3), lambda b: (0, 0, 0)),
            pl.BlockSpec((T, T_out), lambda b: (0, 0)),
        ],
        out_specs=[
            pl.BlockSpec((1, C_MAX, T_out), lambda b: (b, 0, 0)),
            pl.BlockSpec((1, n_shortcut, T), lambda b: (b, 0, 0)),
        ],
        compiler_params=pltpu.CompilerParams(dimension_semantics=("parallel",)),
    )(x, W_packed, P_packed, D)
    return out, shortcut


# ---------------------------------------------------------------------------
# Parameter construction / packing
# ---------------------------------------------------------------------------
def make_conv_params(key, c_in, c_out, k):
    assert c_out % NORM_CHANNELS == 0
    k1, k2, k3, k4 = jax.random.split(key, 4)
    fan_in = c_in * k
    w = jax.random.normal(k1, (c_out, c_in, k), jnp.float32) / np.sqrt(fan_in)
    b = 0.1 * jax.random.normal(k2, (c_out,), jnp.float32)
    gamma = 1.0 + 0.1 * jax.random.normal(k3, (c_out,), jnp.float32)
    beta = 0.1 * jax.random.normal(k4, (c_out,), jnp.float32)
    return dict(w=w, b=b, gamma=gamma, beta=beta)


def pack_layer_params(params_list, c_max, k):
    """Pack per-layer (w, b, gamma, beta) into two zero-padded slabs:
    W: (L, c_max, k*c_max) im2col layout (column index = tap*c_max + c_in),
    P: (L, c_max, 3) with bias / gamma / beta."""
    L = len(params_list)
    W = np.zeros((L, c_max, k * c_max), np.float32)
    P = np.zeros((L, c_max, 3), np.float32)
    for l, p in enumerate(params_list):
        w = np.asarray(p["w"], np.float32)                 # (C_out, C_in, K)
        c_out, c_in, kk = w.shape
        assert kk == k and c_out <= c_max and c_in <= c_max
        assert c_out % NORM_CHANNELS == 0
        wpad = np.zeros((c_max, k, c_max), np.float32)     # (C_out, K, C_in) padded
        wpad[:c_out, :, :c_in] = np.transpose(w, (0, 2, 1))
        W[l] = wpad.reshape(c_max, k * c_max)
        P[l, :c_out, 0] = np.asarray(p["b"], np.float32)
        P[l, :c_out, 1] = np.asarray(p["gamma"], np.float32)
        P[l, :c_out, 2] = np.asarray(p["beta"], np.float32)
    return jnp.asarray(W), jnp.asarray(P)


# ---------------------------------------------------------------------------
# Pure-JAX reference (for correctness check only)
# ---------------------------------------------------------------------------
def reference_forward(x, pre_params, post_params, filt, stride):
    def conv_gn_relu_ref(h, p):
        y = lax.conv_general_dilated(
            h, p["w"], window_strides=(1,), padding="SAME",
            dimension_numbers=("NCH", "OIH", "NCH"),
            precision=lax.Precision.HIGHEST)
        y = y + p["b"][None, :, None]
        Bb, C, Tt = y.shape
        G = C // NORM_CHANNELS
        yg = y.reshape(Bb, G, NORM_CHANNELS * Tt)
        mean = yg.mean(axis=2, keepdims=True)
        var = ((yg - mean) ** 2).mean(axis=2, keepdims=True)
        yn = ((yg - mean) / jnp.sqrt(var + GN_EPS)).reshape(Bb, C, Tt)
        return jnp.maximum(
            yn * p["gamma"][None, :, None] + p["beta"][None, :, None], 0.0)

    sc = x
    for p in pre_params:
        sc = conv_gn_relu_ref(sc, p)
    out = sc
    for p in post_params:
        out = conv_gn_relu_ref(out, p)
    num_pad = (filt.shape[1] - 1) // 2
    xp = jnp.pad(out, ((0, 0), (0, 0), (num_pad, num_pad)), mode="reflect")
    C = out.shape[1]
    out = lax.conv_general_dilated(
        xp, filt[:, None, :], window_strides=(stride,), padding="VALID",
        dimension_numbers=("NCH", "OIH", "NCH"),
        feature_group_count=C, precision=lax.Precision.HIGHEST)
    return out, sc


if __name__ == "__main__":
    # Block hyper-params (small, consistent with the module).
    n_inputs, n_shortcut, n_outputs = 4, 8, 16
    kernel_size, depth = 5, 2
    resample_stride = 2
    B, T = 2, 33                              # T % resample_stride == 1 (sinc req.)

    key = jax.random.PRNGKey(0)
    keys = jax.random.split(key, 2 * depth + 1)

    pre_params = [make_conv_params(keys[0], n_inputs, n_shortcut, kernel_size)]
    pre_params += [make_conv_params(keys[i], n_shortcut, n_shortcut, kernel_size)
                   for i in range(1, depth)]
    post_params = [make_conv_params(keys[depth], n_shortcut, n_outputs, kernel_size)]
    post_params += [make_conv_params(keys[depth + i], n_outputs, n_outputs, kernel_size)
                    for i in range(1, depth)]

    sinc = build_sinc_filter(15, 0.5 / resample_stride)                    # (15,)
    D = jnp.asarray(build_downsample_matrix(T, sinc, resample_stride))     # (T, T_out)
    W_packed, P_packed = pack_layer_params(pre_params + post_params,
                                           n_outputs, kernel_size)

    x = jax.random.normal(keys[-1], (B, n_inputs, T), jnp.float32)

    fwd = jax.jit(lambda xx: downsampling_block_forward(
        xx, W_packed, P_packed, D, n_shortcut=n_shortcut, depth=depth))

    out, shortcut = fwd(x)
    jax.block_until_ready((out, shortcut))

    # Expected shapes: shortcut (B, n_shortcut, T); out (B, n_outputs, (T-1)//2 + 1)
    assert shortcut.shape == (B, n_shortcut, T), shortcut.shape
    assert out.shape == (B, n_outputs, (T - 1) // resample_stride + 1), out.shape
    assert bool(jnp.all(jnp.isfinite(out))) and bool(jnp.all(jnp.isfinite(shortcut)))

    # Correctness check against a pure-JAX reference of the PyTorch module.
    sinc_filt = jnp.asarray(np.repeat(sinc[None, :], n_outputs, axis=0))   # (C, 15)
    out_ref, sc_ref = reference_forward(x, pre_params, post_params,
                                        sinc_filt, resample_stride)
    assert bool(jnp.allclose(shortcut, sc_ref, rtol=1e-2, atol=1e-2))
    assert bool(jnp.allclose(out, out_ref, rtol=1e-2, atol=1e-2))

    print("KERNEL_OK")
</pallas_src>

<mosaic_0001>
module attributes {stable_mosaic.version = 11 : i64} {
  func.func @kernel(%arg0: i32, %arg1: memref<1x4x33xf32, #tpu.memory_space<vmem>>, %arg2: memref<4x16x80xf32, #tpu.memory_space<vmem>>, %arg3: memref<4x16x3xf32, #tpu.memory_space<vmem>>, %arg4: memref<33x17xf32, #tpu.memory_space<vmem>>, %arg5: memref<1x16x17xf32, #tpu.memory_space<vmem>>, %arg6: memref<1x8x33xf32, #tpu.memory_space<vmem>>) attributes {dimension_semantics = [#tpu.dimension_semantics<parallel>], iteration_bounds = array<i64: 2>, scalar_prefetch = 0 : i64, scratch_operands = 0 : i64, tpu.core_type = #tpu.core_type<tc>, window_params = [{transform_indices = @transform_0, window_bounds = array<i64: 1, 4, 33>}, {pipeline_mode = #tpu.pipeline_mode<synchronous>, transform_indices = @transform_1, window_bounds = array<i64: 4, 16, 80>}, {pipeline_mode = #tpu.pipeline_mode<synchronous>, transform_indices = @transform_2, window_bounds = array<i64: 4, 16, 3>}, {pipeline_mode = #tpu.pipeline_mode<synchronous>, transform_indices = @transform_3, window_bounds = array<i64: 33, 17>}, {transform_indices = @transform_4, window_bounds = array<i64: 1, 16, 17>}, {transform_indices = @transform_5, window_bounds = array<i64: 1, 8, 33>}]} {
    %c0 = arith.constant 0 : index
    %c0_0 = arith.constant 0 : index
    %c0_1 = arith.constant 0 : index
    %0 = vector.load %arg1[%c0, %c0_0, %c0_1] : memref<1x4x33xf32, #tpu.memory_space<vmem>>, vector<1x4x33xf32>
    %1 = vector.shape_cast %0 : vector<1x4x33xf32> to vector<4x33xf32>
    %cst = arith.constant 0.000000e+00 : f32
    %2 = vector.broadcast %cst : f32 to vector<12x33xf32>
    %3 = tpu.concatenate %1, %2 in 0 : vector<4x33xf32>, vector<12x33xf32> -> vector<16x33xf32>
    %cst_2 = arith.constant 0.000000e+00 : f32
    %4 = vector.broadcast %cst_2 : f32 to vector<16x2xf32>
    %5 = tpu.concatenate %4, %3, %4 in 1 : vector<16x2xf32>, vector<16x33xf32>, vector<16x2xf32> -> vector<16x37xf32>
    %6 = vector.extract_strided_slice %5 {offsets = [0, 0], sizes = [16, 33], strides = [1, 1]} : vector<16x37xf32> to vector<16x33xf32>
    %7 = vector.extract_strided_slice %5 {offsets = [0, 1], sizes = [16, 33], strides = [1, 1]} : vector<16x37xf32> to vector<16x33xf32>
    %8 = vector.extract_strided_slice %5 {offsets = [0, 2], sizes = [16, 33], strides = [1, 1]} : vector<16x37xf32> to vector<16x33xf32>
    %9 = vector.extract_strided_slice %5 {offsets = [0, 3], sizes = [16, 33], strides = [1, 1]} : vector<16x37xf32> to vector<16x33xf32>
    %10 = vector.extract_strided_slice %5 {offsets = [0, 4], sizes = [16, 33], strides = [1, 1]} : vector<16x37xf32> to vector<16x33xf32>
    %11 = tpu.concatenate %6, %7, %8, %9, %10 in 0 : vector<16x33xf32>, vector<16x33xf32>, vector<16x33xf32>, vector<16x33xf32>, vector<16x33xf32> -> vector<80x33xf32>
    %c0_3 = arith.constant 0 : index
    %c0_4 = arith.constant 0 : index
    %c0_5 = arith.constant 0 : index
    %12 = vector.load %arg2[%c0_3, %c0_4, %c0_5] : memref<4x16x80xf32, #tpu.memory_space<vmem>>, vector<1x16x80xf32>
    %13 = vector.shape_cast %12 : vector<1x16x80xf32> to vector<16x80xf32>
    %cst_6 = arith.constant dense<0.000000e+00> : vector<16x33xf32>
    %14 = tpu.matmul %13, %11, %cst_6 {dimension_numbers = #tpu.dot_dimension_numbers<[1], [0], [0], [1], [0, 0, 1, 1], [], []>} : vector<16x80xf32>, vector<80x33xf32>, vector<16x33xf32> -> vector<16x33xf32>
    %c0_7 = arith.constant 0 : index
    %c0_8 = arith.constant 0 : index
    %c0_9 = arith.constant 0 : index
    %15 = vector.load %arg3[%c0_7, %c0_8, %c0_9] : memref<4x16x3xf32, #tpu.memory_space<vmem>>, vector<1x16x1xf32>
    %16 = vector.shape_cast %15 : vector<1x16x1xf32> to vector<16x1xf32>
    %17 = vector.broadcast %16 : vector<16x1xf32> to vector<16x33xf32>
    %18 = arith.addf %14, %17 : vector<16x33xf32>
    %19 = vector.extract_strided_slice %18 {offsets = [0, 0], sizes = [8, 33], strides = [1, 1]} : vector<16x33xf32> to vector<8x33xf32>
    %20 = vector.shape_cast %19 : vector<8x33xf32> to vector<1x8x33xf32>
    %cst_10 = arith.constant dense<0.000000e+00> : vector<1xf32>
    %21 = vector.multi_reduction <add>, %20, %cst_10 [1, 2] : vector<1x8x33xf32> to vector<1xf32>
    %22 = vector.shape_cast %21 : vector<1xf32> to vector<1x1x1xf32>
    %23 = vector.extract %22[0, 0, 0] : f32 from vector<1x1x1xf32>
    %cst_11 = arith.constant 2.640000e+02 : f32
    %24 = arith.divf %23, %cst_11 : f32
    %25 = vector.broadcast %24 : f32 to vector<8x33xf32>
    %26 = arith.subf %19, %25 : vector<8x33xf32>
    %27 = arith.mulf %26, %26 : vector<8x33xf32>
    %28 = vector.shape_cast %27 : vector<8x33xf32> to vector<1x8x33xf32>
    %cst_12 = arith.constant dense<0.000000e+00> : vector<1xf32>
    %29 = vector.multi_reduction <add>, %28, %cst_12 [1, 2] : vector<1x8x33xf32> to vector<1xf32>
    %30 = vector.shape_cast %29 : vector<1xf32> to vector<1x1x1xf32>
    %31 = vector.extract %30[0, 0, 0] : f32 from vector<1x1x1xf32>
    %cst_13 = arith.constant 2.640000e+02 : f32
    %32 = arith.divf %31, %cst_13 : f32
    %33 = vector.broadcast %24 : f32 to vector<8x33xf32>
    %34 = arith.subf %19, %33 : vector<8x33xf32>
    %cst_14 = arith.constant 9.99999974E-6 : f32
    %35 = arith.addf %32, %cst_14 : f32
    %36 = math.rsqrt %35 : f32
    %37 = vector.broadcast %36 : f32 to vector<8x33xf32>
    %38 = arith.mulf %34, %37 : vector<8x33xf32>
    %39 = vector.extract_strided_slice %18 {offsets = [8, 0], sizes = [8, 33], strides = [1, 1]} : vector<16x33xf32> to vector<8x33xf32>
    %40 = vector.shape_cast %39 : vector<8x33xf32> to vector<1x8x33xf32>
    %cst_15 = arith.constant dense<0.000000e+00> : vector<1xf32>
    %41 = vector.multi_reduction <add>, %40, %cst_15 [1, 2] : vector<1x8x33xf32> to vector<1xf32>
    %42 = vector.shape_cast %41 : vector<1xf32> to vector<1x1x1xf32>
    %43 = vector.extract %42[0, 0, 0] : f32 from vector<1x1x1xf32>
    %cst_16 = arith.constant 2.640000e+02 : f32
    %44 = arith.divf %43, %cst_16 : f32
    %45 = vector.broadcast %44 : f32 to vector<8x33xf32>
    %46 = arith.subf %39, %45 : vector<8x33xf32>
    %47 = arith.mulf %46, %46 : vector<8x33xf32>
    %48 = vector.shape_cast %47 : vector<8x33xf32> to vector<1x8x33xf32>
    %cst_17 = arith.constant dense<0.000000e+00> : vector<1xf32>
    %49 = vector.multi_reduction <add>, %48, %cst_17 [1, 2] : vector<1x8x33xf32> to vector<1xf32>
    %50 = vector.shape_cast %49 : vector<1xf32> to vector<1x1x1xf32>
    %51 = vector.extract %50[0, 0, 0] : f32 from vector<1x1x1xf32>
    %cst_18 = arith.constant 2.640000e+02 : f32
    %52 = arith.divf %51, %cst_18 : f32
    %53 = vector.broadcast %44 : f32 to vector<8x33xf32>
    %54 = arith.subf %39, %53 : vector<8x33xf32>
    %cst_19 = arith.constant 9.99999974E-6 : f32
    %55 = arith.addf %52, %cst_19 : f32
    %56 = math.rsqrt %55 : f32
    %57 = vector.broadcast %56 : f32 to vector<8x33xf32>
    %58 = arith.mulf %54, %57 : vector<8x33xf32>
    %59 = tpu.concatenate %38, %58 in 0 : vector<8x33xf32>, vector<8x33xf32> -> vector<16x33xf32>
    %c0_20 = arith.constant 0 : index
    %c0_21 = arith.constant 0 : index
    %c1 = arith.constant 1 : index
    %60 = vector.load %arg3[%c0_20, %c0_21, %c1] : memref<4x16x3xf32, #tpu.memory_space<vmem>>, vector<1x16x1xf32>
    %61 = vector.shape_cast %60 : vector<1x16x1xf32> to vector<16x1xf32>
    %62 = vector.broadcast %61 : vector<16x1xf32> to vector<16x33xf32>
    %63 = arith.mulf %59, %62 : vector<16x33xf32>
    %c0_22 = arith.constant 0 : index
    %c0_23 = arith.constant 0 : index
    %c2 = arith.constant 2 : index
    %64 = vector.load %arg3[%c0_22, %c0_23, %c2] : memref<4x16x3xf32, #tpu.memory_space<vmem>>, vector<1x16x1xf32>
    %65 = vector.shape_cast %64 : vector<1x16x1xf32> to vector<16x1xf32>
    %66 = vector.broadcast %65 : vector<16x1xf32> to vector<16x33xf32>
    %67 = arith.addf %63, %66 : vector<16x33xf32>
    %cst_24 = arith.constant 0.000000e+00 : f32
    %68 = vector.broadcast %cst_24 : f32 to vector<16x33xf32>
    %69 = arith.maximumf %67, %68 : vector<16x33xf32>
    %70 = tpu.concatenate %4, %69, %4 in 1 : vector<16x2xf32>, vector<16x33xf32>, vector<16x2xf32> -> vector<16x37xf32>
    %71 = vector.extract_strided_slice %70 {offsets = [0, 0], sizes = [16, 33], strides = [1, 1]} : vector<16x37xf32> to vector<16x33xf32>
    %72 = vector.extract_strided_slice %70 {offsets = [0, 1], sizes = [16, 33], strides = [1, 1]} : vector<16x37xf32> to vector<16x33xf32>
    %73 = vector.extract_strided_slice %70 {offsets = [0, 2], sizes = [16, 33], strides = [1, 1]} : vector<16x37xf32> to vector<16x33xf32>
    %74 = vector.extract_strided_slice %70 {offsets = [0, 3], sizes = [16, 33], strides = [1, 1]} : vector<16x37xf32> to vector<16x33xf32>
    %75 = vector.extract_strided_slice %70 {offsets = [0, 4], sizes = [16, 33], strides = [1, 1]} : vector<16x37xf32> to vector<16x33xf32>
    %76 = tpu.concatenate %71, %72, %73, %74, %75 in 0 : vector<16x33xf32>, vector<16x33xf32>, vector<16x33xf32>, vector<16x33xf32>, vector<16x33xf32> -> vector<80x33xf32>
    %c1_25 = arith.constant 1 : index
    %c0_26 = arith.constant 0 : index
    %c0_27 = arith.constant 0 : index
    %77 = vector.load %arg2[%c1_25, %c0_26, %c0_27] : memref<4x16x80xf32, #tpu.memory_space<vmem>>, vector<1x16x80xf32>
    %78 = vector.shape_cast %77 : vector<1x16x80xf32> to vector<16x80xf32>
    %cst_28 = arith.constant dense<0.000000e+00> : vector<16x33xf32>
    %79 = tpu.matmul %78, %76, %cst_28 {dimension_numbers = #tpu.dot_dimension_numbers<[1], [0], [0], [1], [0, 0, 1, 1], [], []>} : vector<16x80xf32>, vector<80x33xf32>, vector<16x33xf32> -> vector<16x33xf32>
    %c1_29 = arith.constant 1 : index
    %c0_30 = arith.constant 0 : index
    %c0_31 = arith.constant 0 : index
    %80 = vector.load %arg3[%c1_29, %c0_30, %c0_31] : memref<4x16x3xf32, #tpu.memory_space<vmem>>, vector<1x16x1xf32>
    %81 = vector.shape_cast %80 : vector<1x16x1xf32> to vector<16x1xf32>
    %82 = vector.broadcast %81 : vector<16x1xf32> to vector<16x33xf32>
    %83 = arith.addf %79, %82 : vector<16x33xf32>
    %84 = vector.extract_strided_slice %83 {offsets = [0, 0], sizes = [8, 33], strides = [1, 1]} : vector<16x33xf32> to vector<8x33xf32>
    %85 = vector.shape_cast %84 : vector<8x33xf32> to vector<1x8x33xf32>
    %cst_32 = arith.constant dense<0.000000e+00> : vector<1xf32>
    %86 = vector.multi_reduction <add>, %85, %cst_32 [1, 2] : vector<1x8x33xf32> to vector<1xf32>
    %87 = vector.shape_cast %86 : vector<1xf32> to vector<1x1x1xf32>
    %88 = vector.extract %87[0, 0, 0] : f32 from vector<1x1x1xf32>
    %cst_33 = arith.constant 2.640000e+02 : f32
    %89 = arith.divf %88, %cst_33 : f32
    %90 = vector.broadcast %89 : f32 to vector<8x33xf32>
    %91 = arith.subf %84, %90 : vector<8x33xf32>
    %92 = arith.mulf %91, %91 : vector<8x33xf32>
    %93 = vector.shape_cast %92 : vector<8x33xf32> to vector<1x8x33xf32>
    %cst_34 = arith.constant dense<0.000000e+00> : vector<1xf32>
    %94 = vector.multi_reduction <add>, %93, %cst_34 [1, 2] : vector<1x8x33xf32> to vector<1xf32>
    %95 = vector.shape_cast %94 : vector<1xf32> to vector<1x1x1xf32>
    %96 = vector.extract %95[0, 0, 0] : f32 from vector<1x1x1xf32>
    %cst_35 = arith.constant 2.640000e+02 : f32
    %97 = arith.divf %96, %cst_35 : f32
    %98 = vector.broadcast %89 : f32 to vector<8x33xf32>
    %99 = arith.subf %84, %98 : vector<8x33xf32>
    %cst_36 = arith.constant 9.99999974E-6 : f32
    %100 = arith.addf %97, %cst_36 : f32
    %101 = math.rsqrt %100 : f32
    %102 = vector.broadcast %101 : f32 to vector<8x33xf32>
    %103 = arith.mulf %99, %102 : vector<8x33xf32>
    %104 = vector.extract_strided_slice %83 {offsets = [8, 0], sizes = [8, 33], strides = [1, 1]} : vector<16x33xf32> to vector<8x33xf32>
    %105 = vector.shape_cast %104 : vector<8x33xf32> to vector<1x8x33xf32>
    %cst_37 = arith.constant dense<0.000000e+00> : vector<1xf32>
    %106 = vector.multi_reduction <add>, %105, %cst_37 [1, 2] : vector<1x8x33xf32> to vector<1xf32>
    %107 = vector.shape_cast %106 : vector<1xf32> to vector<1x1x1xf32>
    %108 = vector.extract %107[0, 0, 0] : f32 from vector<1x1x1xf32>
    %cst_38 = arith.constant 2.640000e+02 : f32
    %109 = arith.divf %108, %cst_38 : f32
    %110 = vector.broadcast %109 : f32 to vector<8x33xf32>
    %111 = arith.subf %104, %110 : vector<8x33xf32>
    %112 = arith.mulf %111, %111 : vector<8x33xf32>
    %113 = vector.shape_cast %112 : vector<8x33xf32> to vector<1x8x33xf32>
    %cst_39 = arith.constant dense<0.000000e+00> : vector<1xf32>
    %114 = vector.multi_reduction <add>, %113, %cst_39 [1, 2] : vector<1x8x33xf32> to vector<1xf32>
    %115 = vector.shape_cast %114 : vector<1xf32> to vector<1x1x1xf32>
    %116 = vector.extract %115[0, 0, 0] : f32 from vector<1x1x1xf32>
    %cst_40 = arith.constant 2.640000e+02 : f32
    %117 = arith.divf %116, %cst_40 : f32
    %118 = vector.broadcast %109 : f32 to vector<8x33xf32>
    %119 = arith.subf %104, %118 : vector<8x33xf32>
    %cst_41 = arith.constant 9.99999974E-6 : f32
    %120 = arith.addf %117, %cst_41 : f32
    %121 = math.rsqrt %120 : f32
    %122 = vector.broadcast %121 : f32 to vector<8x33xf32>
    %123 = arith.mulf %119, %122 : vector<8x33xf32>
    %124 = tpu.concatenate %103, %123 in 0 : vector<8x33xf32>, vector<8x33xf32> -> vector<16x33xf32>
    %c1_42 = arith.constant 1 : index
    %c0_43 = arith.constant 0 : index
    %c1_44 = arith.constant 1 : index
    %125 = vector.load %arg3[%c1_42, %c0_43, %c1_44] : memref<4x16x3xf32, #tpu.memory_space<vmem>>, vector<1x16x1xf32>
    %126 = vector.shape_cast %125 : vector<1x16x1xf32> to vector<16x1xf32>
    %127 = vector.broadcast %126 : vector<16x1xf32> to vector<16x33xf32>
    %128 = arith.mulf %124, %127 : vector<16x33xf32>
    %c1_45 = arith.constant 1 : index
    %c0_46 = arith.constant 0 : index
    %c2_47 = arith.constant 2 : index
    %129 = vector.load %arg3[%c1_45, %c0_46, %c2_47] : memref<4x16x3xf32, #tpu.memory_space<vmem>>, vector<1x16x1xf32>
    %130 = vector.shape_cast %129 : vector<1x16x1xf32> to vector<16x1xf32>
    %131 = vector.broadcast %130 : vector<16x1xf32> to vector<16x33xf32>
    %132 = arith.addf %128, %131 : vector<16x33xf32>
    %cst_48 = arith.constant 0.000000e+00 : f32
    %133 = vector.broadcast %cst_48 : f32 to vector<16x33xf32>
    %134 = arith.maximumf %132, %133 : vector<16x33xf32>
    %135 = vector.extract_strided_slice %134 {offsets = [0, 0], sizes = [8, 33], strides = [1, 1]} : vector<16x33xf32> to vector<8x33xf32>
    %c0_49 = arith.constant 0 : index
    %c0_50 = arith.constant 0 : index
    %c0_51 = arith.constant 0 : index
    %136 = vector.load %arg6[%c0_49, %c0_50, %c0_51] : memref<1x8x33xf32, #tpu.memory_space<vmem>>, vector<1x8x33xf32>
    %137 = vector.shape_cast %136 : vector<1x8x33xf32> to vector<8x33xf32>
    %138 = vector.shape_cast %135 : vector<8x33xf32> to vector<1x8x33xf32>
    tpu.vector_store %arg6[%c0_49, %c0_50, %c0_51], %138 {strides = array<i32>} : memref<1x8x33xf32, #tpu.memory_space<vmem>>, vector<1x8x33xf32>,
    %139 = tpu.concatenate %4, %134, %4 in 1 : vector<16x2xf32>, vector<16x33xf32>, vector<16x2xf32> -> vector<16x37xf32>
    %140 = vector.extract_strided_slice %139 {offsets = [0, 0], sizes = [16, 33], strides = [1, 1]} : vector<16x37xf32> to vector<16x33xf32>
    %141 = vector.extract_strided_slice %139 {offsets = [0, 1], sizes = [16, 33], strides = [1, 1]} : vector<16x37xf32> to vector<16x33xf32>
    %142 = vector.extract_strided_slice %139 {offsets = [0, 2], sizes = [16, 33], strides = [1, 1]} : vector<16x37xf32> to vector<16x33xf32>
    %143 = vector.extract_strided_slice %139 {offsets = [0, 3], sizes = [16, 33], strides = [1, 1]} : vector<16x37xf32> to vector<16x33xf32>
    %144 = vector.extract_strided_slice %139 {offsets = [0, 4], sizes = [16, 33], strides = [1, 1]} : vector<16x37xf32> to vector<16x33xf32>
    %145 = tpu.concatenate %140, %141, %142, %143, %144 in 0 : vector<16x33xf32>, vector<16x33xf32>, vector<16x33xf32>, vector<16x33xf32>, vector<16x33xf32> -> vector<80x33xf32>
    %c2_52 = arith.constant 2 : index
    %c0_53 = arith.constant 0 : index
    %c0_54 = arith.constant 0 : index
    %146 = vector.load %arg2[%c2_52, %c0_53, %c0_54] : memref<4x16x80xf32, #tpu.memory_space<vmem>>, vector<1x16x80xf32>
    %147 = vector.shape_cast %146 : vector<1x16x80xf32> to vector<16x80xf32>
    %cst_55 = arith.constant dense<0.000000e+00> : vector<16x33xf32>
    %148 = tpu.matmul %147, %145, %cst_55 {dimension_numbers = #tpu.dot_dimension_numbers<[1], [0], [0], [1], [0, 0, 1, 1], [], []>} : vector<16x80xf32>, vector<80x33xf32>, vector<16x33xf32> -> vector<16x33xf32>
    %c2_56 = arith.constant 2 : index
    %c0_57 = arith.constant 0 : index
    %c0_58 = arith.constant 0 : index
    %149 = vector.load %arg3[%c2_56, %c0_57, %c0_58] : memref<4x16x3xf32, #tpu.memory_space<vmem>>, vector<1x16x1xf32>
    %150 = vector.shape_cast %149 : vector<1x16x1xf32> to vector<16x1xf32>
    %151 = vector.broadcast %150 : vector<16x1xf32> to vector<16x33xf32>
    %152 = arith.addf %148, %151 : vector<16x33xf32>
    %153 = vector.extract_strided_slice %152 {offsets = [0, 0], sizes = [8, 33], strides = [1, 1]} : vector<16x33xf32> to vector<8x33xf32>
    %154 = vector.shape_cast %153 : vector<8x33xf32> to vector<1x8x33xf32>
    %cst_59 = arith.constant dense<0.000000e+00> : vector<1xf32>
    %155 = vector.multi_reduction <add>, %154, %cst_59 [1, 2] : vector<1x8x33xf32> to vector<1xf32>
    %156 = vector.shape_cast %155 : vector<1xf32> to vector<1x1x1xf32>
    %157 = vector.extract %156[0, 0, 0] : f32 from vector<1x1x1xf32>
    %cst_60 = arith.constant 2.640000e+02 : f32
    %158 = arith.divf %157, %cst_60 : f32
    %159 = vector.broadcast %158 : f32 to vector<8x33xf32>
    %160 = arith.subf %153, %159 : vector<8x33xf32>
    %161 = arith.mulf %160, %160 : vector<8x33xf32>
    %162 = vector.shape_cast %161 : vector<8x33xf32> to vector<1x8x33xf32>
    %cst_61 = arith.constant dense<0.000000e+00> : vector<1xf32>
    %163 = vector.multi_reduction <add>, %162, %cst_61 [1, 2] : vector<1x8x33xf32> to vector<1xf32>
    %164 = vector.shape_cast %163 : vector<1xf32> to vector<1x1x1xf32>
    %165 = vector.extract %164[0, 0, 0] : f32 from vector<1x1x1xf32>
    %cst_62 = arith.constant 2.640000e+02 : f32
    %166 = arith.divf %165, %cst_62 : f32
    %167 = vector.broadcast %158 : f32 to vector<8x33xf32>
    %168 = arith.subf %153, %167 : vector<8x33xf32>
    %cst_63 = arith.constant 9.99999974E-6 : f32
    %169 = arith.addf %166, %cst_63 : f32
    %170 = math.rsqrt %169 : f32
    %171 = vector.broadcast %170 : f32 to vector<8x33xf32>
    %172 = arith.mulf %168, %171 : vector<8x33xf32>
    %173 = vector.extract_strided_slice %152 {offsets = [8, 0], sizes = [8, 33], strides = [1, 1]} : vector<16x33xf32> to vector<8x33xf32>
    %174 = vector.shape_cast %173 : vector<8x33xf32> to vector<1x8x33xf32>
    %cst_64 = arith.constant dense<0.000000e+00> : vector<1xf32>
    %175 = vector.multi_reduction <add>, %174, %cst_64 [1, 2] : vector<1x8x33xf32> to vector<1xf32>
    %176 = vector.shape_cast %175 : vector<1xf32> to vector<1x1x1xf32>
    %177 = vector.extract %176[0, 0, 0] : f32 from vector<1x1x1xf32>
    %cst_65 = arith.constant 2.640000e+02 : f32
    %178 = arith.divf %177, %cst_65 : f32
    %179 = vector.broadcast %178 : f32 to vector<8x33xf32>
    %180 = arith.subf %173, %179 : vector<8x33xf32>
    %181 = arith.mulf %180, %180 : vector<8x33xf32>
    %182 = vector.shape_cast %181 : vector<8x33xf32> to vector<1x8x33xf32>
    %cst_66 = arith.constant dense<0.000000e+00> : vector<1xf32>
    %183 = vector.multi_reduction <add>, %182, %cst_66 [1, 2] : vector<1x8x33xf32> to vector<1xf32>
    %184 = vector.shape_cast %183 : vector<1xf32> to vector<1x1x1xf32>
    %185 = vector.extract %184[0, 0, 0] : f32 from vector<1x1x1xf32>
    %cst_67 = arith.constant 2.640000e+02 : f32
    %186 = arith.divf %185, %cst_67 : f32
    %187 = vector.broadcast %178 : f32 to vector<8x33xf32>
    %188 = arith.subf %173, %187 : vector<8x33xf32>
    %cst_68 = arith.constant 9.99999974E-6 : f32
    %189 = arith.addf %186, %cst_68 : f32
    %190 = math.rsqrt %189 : f32
    %191 = vector.broadcast %190 : f32 to vector<8x33xf32>
    %192 = arith.mulf %188, %191 : vector<8x33xf32>
    %193 = tpu.concatenate %172, %192 in 0 : vector<8x33xf32>, vector<8x33xf32> -> vector<16x33xf32>
    %c2_69 = arith.constant 2 : index
    %c0_70 = arith.constant 0 : index
    %c1_71 = arith.constant 1 : index
    %194 = vector.load %arg3[%c2_69, %c0_70, %c1_71] : memref<4x16x3xf32, #tpu.memory_space<vmem>>, vector<1x16x1xf32>
    %195 = vector.shape_cast %194 : vector<1x16x1xf32> to vector<16x1xf32>
    %196 = vector.broadcast %195 : vector<16x1xf32> to vector<16x33xf32>
    %197 = arith.mulf %193, %196 : vector<16x33xf32>
    %c2_72 = arith.constant 2 : index
    %c0_73 = arith.constant 0 : index
    %c2_74 = arith.constant 2 : index
    %198 = vector.load %arg3[%c2_72, %c0_73, %c2_74] : memref<4x16x3xf32, #tpu.memory_space<vmem>>, vector<1x16x1xf32>
    %199 = vector.shape_cast %198 : vector<1x16x1xf32> to vector<16x1xf32>
    %200 = vector.broadcast %199 : vector<16x1xf32> to vector<16x33xf32>
    %201 = arith.addf %197, %200 : vector<16x33xf32>
    %cst_75 = arith.constant 0.000000e+00 : f32
    %202 = vector.broadcast %cst_75 : f32 to vector<16x33xf32>
    %203 = arith.maximumf %201, %202 : vector<16x33xf32>
    %204 = tpu.concatenate %4, %203, %4 in 1 : vector<16x2xf32>, vector<16x33xf32>, vector<16x2xf32> -> vector<16x37xf32>
    %205 = vector.extract_strided_slice %204 {offsets = [0, 0], sizes = [16, 33], strides = [1, 1]} : vector<16x37xf32> to vector<16x33xf32>
    %206 = vector.extract_strided_slice %204 {offsets = [0, 1], sizes = [16, 33], strides = [1, 1]} : vector<16x37xf32> to vector<16x33xf32>
    %207 = vector.extract_strided_slice %204 {offsets = [0, 2], sizes = [16, 33], strides = [1, 1]} : vector<16x37xf32> to vector<16x33xf32>
    %208 = vector.extract_strided_slice %204 {offsets = [0, 3], sizes = [16, 33], strides = [1, 1]} : vector<16x37xf32> to vector<16x33xf32>
    %209 = vector.extract_strided_slice %204 {offsets = [0, 4], sizes = [16, 33], strides = [1, 1]} : vector<16x37xf32> to vector<16x33xf32>
    %210 = tpu.concatenate %205, %206, %207, %208, %209 in 0 : vector<16x33xf32>, vector<16x33xf32>, vector<16x33xf32>, vector<16x33xf32>, vector<16x33xf32> -> vector<80x33xf32>
    %c3 = arith.constant 3 : index
    %c0_76 = arith.constant 0 : index
    %c0_77 = arith.constant 0 : index
    %211 = vector.load %arg2[%c3, %c0_76, %c0_77] : memref<4x16x80xf32, #tpu.memory_space<vmem>>, vector<1x16x80xf32>
    %212 = vector.shape_cast %211 : vector<1x16x80xf32> to vector<16x80xf32>
    %cst_78 = arith.constant dense<0.000000e+00> : vector<16x33xf32>
    %213 = tpu.matmul %212, %210, %cst_78 {dimension_numbers = #tpu.dot_dimension_numbers<[1], [0], [0], [1], [0, 0, 1, 1], [], []>} : vector<16x80xf32>, vector<80x33xf32>, vector<16x33xf32> -> vector<16x33xf32>
    %c3_79 = arith.constant 3 : index
    %c0_80 = arith.constant 0 : index
    %c0_81 = arith.constant 0 : index
    %214 = vector.load %arg3[%c3_79, %c0_80, %c0_81] : memref<4x16x3xf32, #tpu.memory_space<vmem>>, vector<1x16x1xf32>
    %215 = vector.shape_cast %214 : vector<1x16x1xf32> to vector<16x1xf32>
    %216 = vector.broadcast %215 : vector<16x1xf32> to vector<16x33xf32>
    %217 = arith.addf %213, %216 : vector<16x33xf32>
    %218 = vector.extract_strided_slice %217 {offsets = [0, 0], sizes = [8, 33], strides = [1, 1]} : vector<16x33xf32> to vector<8x33xf32>
    %219 = vector.shape_cast %218 : vector<8x33xf32> to vector<1x8x33xf32>
    %cst_82 = arith.constant dense<0.000000e+00> : vector<1xf32>
    %220 = vector.multi_reduction <add>, %219, %cst_82 [1, 2] : vector<1x8x33xf32> to vector<1xf32>
    %221 = vector.shape_cast %220 : vector<1xf32> to vector<1x1x1xf32>
    %222 = vector.extract %221[0, 0, 0] : f32 from vector<1x1x1xf32>
    %cst_83 = arith.constant 2.640000e+02 : f32
    %223 = arith.divf %222, %cst_83 : f32
    %224 = vector.broadcast %223 : f32 to vector<8x33xf32>
    %225 = arith.subf %218, %224 : vector<8x33xf32>
    %226 = arith.mulf %225, %225 : vector<8x33xf32>
    %227 = vector.shape_cast %226 : vector<8x33xf32> to vector<1x8x33xf32>
    %cst_84 = arith.constant dense<0.000000e+00> : vector<1xf32>
    %228 = vector.multi_reduction <add>, %227, %cst_84 [1, 2] : vector<1x8x33xf32> to vector<1xf32>
    %229 = vector.shape_cast %228 : vector<1xf32> to vector<1x1x1xf32>
    %230 = vector.extract %229[0, 0, 0] : f32 from vector<1x1x1xf32>
    %cst_85 = arith.constant 2.640000e+02 : f32
    %231 = arith.divf %230, %cst_85 : f32
    %232 = vector.broadcast %223 : f32 to vector<8x33xf32>
    %233 = arith.subf %218, %232 : vector<8x33xf32>
    %cst_86 = arith.constant 9.99999974E-6 : f32
    %234 = arith.addf %231, %cst_86 : f32
    %235 = math.rsqrt %234 : f32
    %236 = vector.broadcast %235 : f32 to vector<8x33xf32>
    %237 = arith.mulf %233, %236 : vector<8x33xf32>
    %238 = vector.extract_strided_slice %217 {offsets = [8, 0], sizes = [8, 33], strides = [1, 1]} : vector<16x33xf32> to vector<8x33xf32>
    %239 = vector.shape_cast %238 : vector<8x33xf32> to vector<1x8x33xf32>
    %cst_87 = arith.constant dense<0.000000e+00> : vector<1xf32>
    %240 = vector.multi_reduction <add>, %239, %cst_87 [1, 2] : vector<1x8x33xf32> to vector<1xf32>
    %241 = vector.shape_cast %240 : vector<1xf32> to vector<1x1x1xf32>
    %242 = vector.extract %241[0, 0, 0] : f32 from vector<1x1x1xf32>
    %cst_88 = arith.constant 2.640000e+02 : f32
    %243 = arith.divf %242, %cst_88 : f32
    %244 = vector.broadcast %243 : f32 to vector<8x33xf32>
    %245 = arith.subf %238, %244 : vector<8x33xf32>
    %246 = arith.mulf %245, %245 : vector<8x33xf32>
    %247 = vector.shape_cast %246 : vector<8x33xf32> to vector<1x8x33xf32>
    %cst_89 = arith.constant dense<0.000000e+00> : vector<1xf32>
    %248 = vector.multi_reduction <add>, %247, %cst_89 [1, 2] : vector<1x8x33xf32> to vector<1xf32>
    %249 = vector.shape_cast %248 : vector<1xf32> to vector<1x1x1xf32>
    %250 = vector.extract %249[0, 0, 0] : f32 from vector<1x1x1xf32>
    %cst_90 = arith.constant 2.640000e+02 : f32
    %251 = arith.divf %250, %cst_90 : f32
    %252 = vector.broadcast %243 : f32 to vector<8x33xf32>
    %253 = arith.subf %238, %252 : vector<8x33xf32>
    %cst_91 = arith.constant 9.99999974E-6 : f32
    %254 = arith.addf %251, %cst_91 : f32
    %255 = math.rsqrt %254 : f32
    %256 = vector.broadcast %255 : f32 to vector<8x33xf32>
    %257 = arith.mulf %253, %256 : vector<8x33xf32>
    %258 = tpu.concatenate %237, %257 in 0 : vector<8x33xf32>, vector<8x33xf32> -> vector<16x33xf32>
    %c3_92 = arith.constant 3 : index
    %c0_93 = arith.constant 0 : index
    %c1_94 = arith.constant 1 : index
    %259 = vector.load %arg3[%c3_92, %c0_93, %c1_94] : memref<4x16x3xf32, #tpu.memory_space<vmem>>, vector<1x16x1xf32>
    %260 = vector.shape_cast %259 : vector<1x16x1xf32> to vector<16x1xf32>
    %261 = vector.broadcast %260 : vector<16x1xf32> to vector<16x33xf32>
    %262 = arith.mulf %258, %261 : vector<16x33xf32>
    %c3_95 = arith.constant 3 : index
    %c0_96 = arith.constant 0 : index
    %c2_97 = arith.constant 2 : index
    %263 = vector.load %arg3[%c3_95, %c0_96, %c2_97] : memref<4x16x3xf32, #tpu.memory_space<vmem>>, vector<1x16x1xf32>
    %264 = vector.shape_cast %263 : vector<1x16x1xf32> to vector<16x1xf32>
    %265 = vector.broadcast %264 : vector<16x1xf32> to vector<16x33xf32>
    %266 = arith.addf %262, %265 : vector<16x33xf32>
    %cst_98 = arith.constant 0.000000e+00 : f32
    %267 = vector.broadcast %cst_98 : f32 to vector<16x33xf32>
    %268 = arith.maximumf %266, %267 : vector<16x33xf32>
    %c0_99 = arith.constant 0 : index
    %c0_100 = arith.constant 0 : index
    %269 = vector.load %arg4[%c0_99, %c0_100] : memref<33x17xf32, #tpu.memory_space<vmem>>, vector<33x17xf32>
    %cst_101 = arith.constant dense<0.000000e+00> : vector<16x17xf32>
    %270 = tpu.matmul %268, %269, %cst_101 {dimension_numbers = #tpu.dot_dimension_numbers<[1], [0], [0], [1], [0, 0, 1, 1], [], []>} : vector<16x33xf32>, vector<33x17xf32>, vector<16x17xf32> -> vector<16x17xf32>
    %c0_102 = arith.constant 0 : index
    %c0_103 = arith.constant 0 : index
    %c0_104 = arith.constant 0 : index
    %271 = vector.load %arg5[%c0_102, %c0_103, %c0_104] : memref<1x16x17xf32, #tpu.memory_space<vmem>>, vector<1x16x17xf32>
    %272 = vector.shape_cast %271 : vector<1x16x17xf32> to vector<16x17xf32>
    %273 = vector.shape_cast %270 : vector<16x17xf32> to vector<1x16x17xf32>
    tpu.vector_store %arg5[%c0_102, %c0_103, %c0_104], %273 {strides = array<i32>} : memref<1x16x17xf32, #tpu.memory_space<vmem>>, vector<1x16x17xf32>,
    return
  }
  func.func @transform_0(%arg0: i32) -> (i32, i32, i32) {
    %c0_i32 = arith.constant 0 : i32
    %c0_i32_0 = arith.constant 0 : i32
    %c0_i32_1 = arith.constant 0 : i32
    return %arg0, %c0_i32, %c0_i32_0 : i32, i32, i32
  }
  func.func @transform_1(%arg0: i32) -> (i32, i32, i32) {
    %c0_i32 = arith.constant 0 : i32
    %c0_i32_0 = arith.constant 0 : i32
    %c0_i32_1 = arith.constant 0 : i32
    %c0_i32_2 = arith.constant 0 : i32
    return %c0_i32, %c0_i32_0, %c0_i32_1 : i32, i32, i32
  }
  func.func @transform_2(%arg0: i32) -> (i32, i32, i32) {
    %c0_i32 = arith.constant 0 : i32
    %c0_i32_0 = arith.constant 0 : i32
    %c0_i32_1 = arith.constant 0 : i32
    %c0_i32_2 = arith.constant 0 : i32
    return %c0_i32, %c0_i32_0, %c0_i32_1 : i32, i32, i32
  }
  func.func @transform_3(%arg0: i32) -> (i32, i32) {
    %c0_i32 = arith.constant 0 : i32
    %c0_i32_0 = arith.constant 0 : i32
    %c0_i32_1 = arith.constant 0 : i32
    return %c0_i32, %c0_i32_0 : i32, i32
  }
  func.func @transform_4(%arg0: i32) -> (i32, i32, i32) {
    %c0_i32 = arith.constant 0 : i32
    %c0_i32_0 = arith.constant 0 : i32
    %c0_i32_1 = arith.constant 0 : i32
    return %arg0, %c0_i32, %c0_i32_0 : i32, i32, i32
  }
  func.func @transform_5(%arg0: i32) -> (i32, i32, i32) {
    %c0_i32 = arith.constant 0 : i32
    %c0_i32_0 = arith.constant 0 : i32
    %c0_i32_1 = arith.constant 0 : i32
    return %arg0, %c0_i32, %c0_i32_0 : i32, i32, i32
  }
}

</mosaic_0001>

<bundles_post_ra>
// kernel: _lambda_.1
= control target key start
LH: loop header
LB: loop body
LE: loop exit
PB: predicated region body
PF: predicated region fallthrough
CT: control target
= control target key end

     0   :  { %11 = vsyncpa [#allocation3], 0  ;;  %s2464_s0 = inlined_call_operand.hbm [shape: f32[2,4,33], index: 0, kind: input, shape index: {}]   ;;  %s2465_s1 = inlined_call_operand.hbm [shape: f32[4,16,80], index: 1, kind: input, shape index: {}]   ;;  %s2466_s2 = inlined_call_operand.hbm [shape: f32[4,16,3], index: 2, kind: input, shape index: {}]   ;;  %s2467_s3 = inlined_call_operand.hbm [shape: f32[33,17], index: 3, kind: input, shape index: {}]   ;;  %s2468_s4 = inlined_call_operand.hbm [shape: f32[2,16,17], index: 4, kind: output, shape index: {0}]   ;;  %s2469_s5 = inlined_call_operand.hbm [shape: f32[2,8,33], index: 5, kind: output, shape index: {1}]  }
   0x1   :  { %13 = vsyncpa [#allocation3 + $0x1], 0 }
   0x2   :  { %14 = vsyncpa [#allocation6], 0 }
   0x3   :  { %15 = vsyncpa [#allocation9], 0 }
   0x4   :  { %16 = vsyncpa [#allocation4], 0 }
   0x5   :  { %18 = vsyncpa [#allocation4 + $0x1], 0 }
   0x6   :  { %19 = vsyncpa [#allocation12], 0 }
   0x7   :  { %21 = vsyncpa [#allocation12 + $0x1], 0  ;;  %s2107_s18 = smov 0   ;;  %s2109_s19 = smov 0  }
   0x8   :  { %s2111_s20 = smov 0   ;;  %s2113_s21 = smov 0  }
   0x9 LB: > { %s2128_s22 = sadd.s32 4294967295, %s2056_s21   ;;  %s1468_s23 = sadd.s32 4294967294, %s2056_s21   ;;  %s2056_s21 = sphi %s2113_s21, %s2493_s21   ;;  %s2052_s20 = sphi %s2111_s20, %s2492_s20   ;;  %s2048_s19 = sphi %s2109_s19, %s2491_s19   ;;  %s2044_s18 = sphi %s2107_s18, %s2490_s18  }
   0xa   : > { %p47_p0 = scmp.ne.s32.totalorder %s2048_s19, %s2044_s18  ;;  %p2470_p1 = scmp.eq.s32.totalorder %s2128_s22, 0 }
   0xb   : > { %p140_p3 = scmp.eq.s32.totalorder %s1468_s23, 1  ;;  %p1469_p5 = scmp.ge.s32.totalorder %s2056_s21, 1 }
   0xc   : > { %p2137_p4 = por %p2470_p1, %p47_p0  ;;  %p173_p7 = scmp.lt.s32.totalorder %s2056_s21, 3 }
   0xd   : > { %p2142_p6 = por %p140_p3, %p47_p0  ;;  %s2058_s27 = smov [#allocation5]  }
   0xe   : > { %s2474_s24 = scalar_select %p2137_p4, 1, 0 }
   0xf   : > { %s2475_s25 = scalar_select %p2142_p6, 1, 0 }
  0x10   : > { %p2147_p8 = pnand %p1469_p5, %p173_p7  ;;  %s185_s28 = sshll.u32 %s2058_s27, 4  ;;  %s186_s28 = int_to_ptr.vmem [resolvable:$true] %s185_s28 }
  0x11   : > { %s2059_s30 = smov [#allocation7]   ;;  %s2060_s7 = smov [#allocation8]  }
  0x12   : > { %s2476_s26 = scalar_select %p2147_p8, 1, 0 }
  0x13   : > { %p1736_p9 = pneg %p2147_p8  ;;  %s198_s6 = sshll.u32 %s2059_s30, 4  ;;  %s199_s6 = int_to_ptr.vmem [resolvable:$true] %s198_s6 }
  0x14   : > { %s211_s8 = sshll.u32 %s2060_s7, 4  ;;  %s1859_s9 = scalar_lea.vmem %s186_s28, 1024  ;;  %s212_s8 = int_to_ptr.vmem [resolvable:$true] %s211_s8 }
  0x15   : > { %p2156_p11 = pnand %p1736_p9, %p2470_p1  ;;  %p1860_p13 = scmp.ne.s32.totalorder %s186_s28, %s1859_s9 }
  0x16   : > { %p1867_p5 = scmp.lt.s32.totalorder %s186_s28, %s186_s28  ;;  %p1868_p7 = scmp.lt.s32.totalorder %s1859_s9, %s1859_s9 }
  0x17   : > { %p1850_p12 = pneg %p2156_p11 }
  0x18   : > { %p1869_p9 = por %p1868_p7, %p1867_p5 }
  0x19   : > { %p1862_p0 = pnand %p1860_p13, %p1850_p12 }
  0x1b   : > { %p1863_p3 = pneg %p1862_p0 }
  0x1d   : > { %p1870_p10 = pnand %p1869_p9, %p1863_p3 }
  0x1f   : > { %1873 = shalt.err (!%p1870_p10)
}
  0x20   : > { %s2061_s10 = smov 128   ;;  %s2062_s11 = smov 8  }
  0x21   : > { %1739 = dma.hbm_to_vmem [thread:$0]  (!%p2156_p11), %s2465_s1, 1024, %s186_s28, [#allocation6], %s2061_s10, %s2061_s10, %s2062_s11  }
  0x22   : > { %s1885_s14 = scalar_lea.vmem %s199_s6, 1024  ;;  %p1893_p2 = scmp.lt.s32.totalorder %s199_s6, %s199_s6 }
  0x23   : > { %p1886_p1 = scmp.ne.s32.totalorder %s199_s6, %s1885_s14  ;;  %p1894_p6 = scmp.lt.s32.totalorder %s1885_s14, %s1885_s14 }
  0x25   : > { %p1888_p13 = pnand %p1886_p1, %p1850_p12  ;;  %p1895_p5 = por %p1894_p6, %p1893_p2 }
  0x27   : > { %p1889_p0 = pneg %p1888_p13 }
  0x29   : > { %p1896_p3 = pnand %p1895_p5, %p1889_p0 }
  0x2b   : > { %1899 = shalt.err (!%p1896_p3)
}
  0x2c   : > { %1742 = dma.hbm_to_vmem [thread:$0]  (!%p2156_p11), %s2466_s2, 1024, %s199_s6, [#allocation6], %s2061_s10, %s2061_s10, %s2062_s11  }
  0x2d   : > { %s1911_s17 = scalar_lea.vmem %s212_s8, 640  ;;  %p1919_p9 = scmp.lt.s32.totalorder %s212_s8, %s212_s8 }
  0x2e   : > { %p1912_p10 = scmp.ne.s32.totalorder %s212_s8, %s1911_s17  ;;  %p1920_p13 = scmp.lt.s32.totalorder %s1911_s17, %s1911_s17 }
  0x30   : > { %p1914_p7 = pnand %p1912_p10, %p1850_p12  ;;  %p1921_p4 = por %p1920_p13, %p1919_p9 }
  0x32   : > { %p1915_p1 = pneg %p1914_p7 }
  0x34   : > { %p1922_p2 = pnand %p1921_p4, %p1915_p1 }
  0x36   : > { %1925 = shalt.err (!%p1922_p2)
}
  0x37   : > { %1745 = dma.hbm_to_vmem [thread:$0]  (!%p2156_p11), %s2467_s3, 640, %s212_s8, [#allocation9], %s2061_s10, %s2061_s10, %s2062_s11  }
  0x38   : > { %s2187_s28 = sadd.s32 1, %s2056_s21   ;;  %s34_s29 = sadd.s32 1, %s2052_s20 }
  0x39   : > { %s31_s30 = ssub.s32 %s2056_s21, %s2187_s28  ;;  %p41_p6 = scmp.ne.s32.totalorder %s2052_s20, %s2048_s19 }
  0x3a   : > { %p32_p4 = scmp.eq.s32.totalorder %s31_s30, 0  ;;  %p42_p12 = scmp.eq.s32.totalorder %s2056_s21, 0 }
  0x3b   : > { %p1760_p0 = scmp.lt.s32.totalorder %s2056_s21, 2  ;;  %p2478_p3 = scmp.eq.s32.totalorder %s2128_s22, 1 }
  0x3c   : > { %s2197_s6 = scalar_select %p32_p4, %s2052_s20, %s34_s29  }
  0x3d   : > { %p43_p5 = por %p42_p12, %p41_p6  ;;  %p2201_p10 = por %p2478_p3, %p41_p6 }
  0x3e   : > { %s225_s9 = sand.u32 1, %s2052_s20   ;;  %s1475_s12 = sshll.u32 %s2056_s21, 6 }
  0x3f   : > { %s2479_s7 = scalar_select %p2201_p10, 1, 0 }
  0x40   : > { %s1474_s8 = sshll.u32 %s225_s9, 2  ;;  %s2210_s13 = scalar_lea.hbm %s2464_s0, %s1475_s12 }
  0x41   : > { %s229_s14 = scalar_lea.vmem [#allocation2], %s1474_s8  ;;  %p2212_p11 = pnand %p1760_p0, %p43_p5 }
  0x42   : > { %s236_s15 = sshll.u32 %s229_s14, 4  ;;  %s226_s17 = scalar_lea.sflag [#allocation3], %s225_s9  ;;  %s237_s15 = int_to_ptr.vmem [resolvable:$true] %s236_s15 }
  0x43   : > { %s1926_s23 = scalar_lea.hbm %s2210_s13, 64  ;;  %p1928_p1 = pneg %p2212_p11 }
  0x44   : > { %p1927_p7 = scmp.ne.s32.totalorder %s2210_s13, %s1926_s23  ;;  %s1931_s29 = scalar_lea.hbm %s2464_s0, 128 }
  0x45   : > { %p1932_p2 = scmp.lt.s32.totalorder %s2210_s13, %s2464_s0  ;;  %p1933_p4 = scmp.lt.s32.totalorder %s1931_s29, %s1926_s23 }
  0x46   : > { %p1929_p9 = pnand %p1928_p1, %p1927_p7 }
  0x47   : > { %p1934_p6 = por %p1933_p4, %p1932_p2 }
  0x48   : > { %p1930_p13 = pneg %p1929_p9 }
  0x4a   : > { %p1935_p12 = pnand %p1934_p6, %p1930_p13 }
  0x4c   : > { %1938 = shalt.err (!%p1935_p12)
}
  0x4d   : > { %s1939_s10 = scalar_lea.vmem %s237_s15, 64  ;;  %s2063_s9 = smov [#allocation2]  }
  0x4e   : > { %p1940_p0 = scmp.ne.s32.totalorder %s237_s15, %s1939_s10  ;;  %s1944_s11 = sshll.u32 %s2063_s9, 4  ;;  %s1945_s11 = int_to_ptr.vmem [resolvable:$false] %s1944_s11 }
  0x4f   : > { %s1946_s14 = scalar_lea.vmem %s1945_s11, 128  ;;  %p1947_p7 = scmp.lt.s32.totalorder %s237_s15, %s1945_s11 }
  0x50   : > { %p1942_p5 = pnand %p1940_p0, %p1928_p1  ;;  %p1948_p9 = scmp.lt.s32.totalorder %s1946_s14, %s1939_s10 }
  0x52   : > { %p1943_p3 = pneg %p1942_p5  ;;  %p1949_p10 = por %p1948_p9, %p1947_p7 }
  0x54   : > { %p1950_p8 = pnand %p1949_p10, %p1943_p3 }
  0x56   : > { %1953 = shalt.err (!%p1950_p8)
}
  0x57   : > { %1749 = dma.hbm_to_vmem [thread:$0]  (!%p2212_p11), %s2210_s13, 64, %s237_s15, %s226_s17  }
  0x58   : > { %p2481_p13 = scmp.ne.s32.totalorder %s2476_s26, 0 }
  0x59   : > { %s2233_s23 = sand.u32 (!%p2481_p13), 1, %s2048_s19   ;;  %p2482_p1 = scmp.ne.s32.totalorder (!%p2481_p13), %s2474_s24, 0 }
  0x5a   : > { %245 = sbr.rel (%p2481_p13) target bundleno = 5263 (0x148f), region = 36  ;;  %s1477_s27 = sshll.u32 (!%p2481_p13), %s2233_s23, 2 }
  0x5b   : > { %s248_s30 = scalar_lea.sflag (!%p2481_p13), [#allocation3], %s2233_s23  ;;  %s251_s29 = scalar_lea.vmem (!%p2481_p13), [#allocation2], %s1477_s27 }
  0x5f   : > { %2023 = dma.done.wait (%p2482_p1), %s248_s30, 64  }
  0x60   : > { %2025 = vsyncadd (%p2482_p1), %s248_s30, 4294967232  ;;  %p2483_p8 = scmp.eq.s32.totalorder %s2128_s22, 0 }
  0x62   : > { %2027 = dma.done.wait (%p2483_p8), [#allocation6], 2048   ;;  %p2484_p10 = pmov %p2483_p8 }
  0x63   : > { %p2485_p11 = pmov %p2483_p8 }
  0x64   : > { %2029 = vsyncadd (%p2484_p10), [#allocation6], 4294965248 }
  0x65   : > { %2031 = dma.done.wait (%p2485_p11), [#allocation9], 640   ;;  %p2486_p2 = pmov %p2483_p8 }
  0x66   : > { %v2064_v0 = vmov 0.0   ;;  %s2065_s26 = smov 2   ;;  %vm296_vm0 = vcmask 1043456   ;;  %v295_v1 = vld [vmem:[%s251_s29] sm:$0xf]  ;;  %vm306_vm1 = vcmask 15360  }
  0x67   : > { %2033 = vsyncadd (%p2486_p2), [#allocation9], 4294966656  ;;  %302 = vrot.lane.b32.xlu0 %v2064_v0, %s2065_s26  ;;  %v297_v2 = vsel %vm296_vm0, %v295_v1, 0.0  ;;  %vm309_vm2 = vcmask 285696   ;;  %s2066_s24 = smov 125   ;;  %s2067_s13 = smov 124  }
  0x68   : > { %s2068_s15 = smov 126   ;;  %s2069_s16 = smov 127   ;;  %v338_v9 = vld [vmem:[#allocation5] sm:$0xff]  ;;  %vm352_vm3 = vcmask 654336   ;;  %v2070_v11 = vmov 0   ;;  %v339_v20 = vld [vmem:[#allocation5 + $0x8] sm:$0xff] }
  0x69   : > { %1585 = vmatprep.mubr.msk.f32.mxu0 %vm352_vm3, %v338_v9  ;;  %v2262_v10 = vld [vmem:[#allocation7] sm:$0xff]  ;;  %1813 = vset.pattern.permute.xlu0 %v2070_v11  ;;  %vm434_vm4 = vcmask 269312   ;;  %v341_v26 = vld [vmem:[#allocation7 + $0x8] sm:$0xff]  ;;  %v2071_v41 = vmov 1   ;;  %v2072_v42 = vmov 2   ;;  %vm1220_vm5 = vcmask 1040384  }
  0x6a   : > { %1814 = vset.pattern.permute.xlu1 %v2070_v11  ;;  %p2487_p6 = scmp.ne.s32.totalorder %s2479_s7, 0 }
  0x6b   : > { %300 = vrot.lane.b32.xlu0 %v297_v2, %s2065_s26 }
  0xd9   : > { %v303_v3 = vpop.permute.xlu0 %302 }
  0xda   : > { %v308_v4 = vsel %vm306_vm1, 0.0, %v303_v3 }
  0xdb   : > { %v311_v5 = vsel %vm309_vm2, %v308_v4, 0.0 }
  0xdc   : > { %328 = vrot.lane.b32.xlu0 %v311_v5, %s2066_s24  ;;  %334 = vrot.lane.b32.xlu1 %v311_v5, %s2067_s13 }
  0xdd   : > { %v301_v6 = vpop.permute.xlu0 %300 }
  0xde   : > { %v307_v7 = vsel %vm306_vm1, 0.0, %v301_v6 }
  0xdf   : > { %v310_v8 = vsel %vm309_vm2, %v307_v7, 0.0 }
  0xe0   : > { %322 = vrot.lane.b32.xlu0 %v311_v5, %s2068_s15  ;;  %332 = vrot.lane.b32.xlu1 %v310_v8, %s2067_s13 }
  0xe4   : > { %316 = vrot.lane.b32.xlu0 %v311_v5, %s2069_s16  ;;  %326 = vrot.lane.b32.xlu1 %v310_v8, %s2066_s24 }
  0xe8   : > { %344 = vperm.xlu0 %1813, %v2262_v10   ;;  %320 = vrot.lane.b32.xlu1 %v310_v8, %s2068_s15 }
  0xec   : > { %314 = vrot.lane.b32.xlu1 %v310_v8, %s2069_s16  ;;  %1815 = vset.pattern.permute.xlu0 %v2071_v41 }
 0x14e   : > { %v335_v12 = vpop.permute.xlu1 %334  ;;  %v329_v13 = vpop.permute.xlu0 %328 }
 0x14f   : > { %1565 = vmatprep.subr.mxu0 %v335_v12 }
 0x150   : > { %1566 = vmatpush3.msra.mxu0 %v335_v12 }
 0x152   : > { %v333_v14 = vpop.permute.xlu1 %332  ;;  %v323_v15 = vpop.permute.xlu0 %322 }
 0x153   : > { %1567 = vmatprep.subr.mxu0 %v333_v14 }
 0x154   : > { %1568 = vmatpush3.msra.mxu0 %v333_v14 }
 0x155   : > { %1569 = vmatprep.subr.mxu0 %v329_v13 }
 0x156   : > { %v327_v16 = vpop.permute.xlu1 %326  ;;  %1570 = vmatpush3.msra.mxu0 %v329_v13  ;;  %v317_v18 = vpop.permute.xlu0 %316 }
 0x157   : > { %1571 = vmatprep.subr.mxu0 %v327_v16 }
 0x158   : > { %1572 = vmatpush3.msra.mxu0 %v327_v16 }
 0x159   : > { %1573 = vmatprep.subr.mxu0 %v323_v15 }
 0x15a   : > { %v321_v17 = vpop.permute.xlu1 %320  ;;  %1574 = vmatpush3.msra.mxu0 %v323_v15 }
 0x15b   : > { %1575 = vmatprep.subr.mxu0 %v321_v17 }
 0x15c   : > { %1576 = vmatpush3.msra.mxu0 %v321_v17 }
 0x15d   : > { %1577 = vmatprep.subr.mxu0 %v317_v18 }
 0x15e   : > { %v315_v19 = vpop.permute.xlu1 %314  ;;  %1578 = vmatpush3.msra.mxu0 %v317_v18 }
 0x15f   : > { %1579 = vmatprep.subr.mxu0 %v315_v19 }
 0x160   : > { %1580 = vmatpush3.msra.mxu0 %v315_v19 }
 0x161   : > { %1581 = vmatprep.subr.msk.mxu0 %vm309_vm2, %v308_v4 }
 0x162   : > { %1582 = vmatpush3.msk.msra.mxu0 %vm309_vm2, %v308_v4 }
 0x163   : > { %1583 = vmatprep.subr.msk.mxu0 %vm309_vm2, %v307_v7  ;;  %v345_v22 = vpop.permute.xlu0 %344 }
 0x164   : > { %1584 = vmatpush3.msk.msra.mxu0 %vm309_vm2, %v307_v7 }
 0x165   : > { %1586 = vmatmul.mubr.msk.f32.vlgmr.msra.gmra.mxu0 %vm352_vm3, %v339_v20 }
 0x225   : > { %v1587_v21 = vpop.f32.mrf.mxu0 }
 0x227   : > { %v425_v23 = vpop.f32.mrf.mxu0 }
 0x228   : > { %v426_v24 = vadd.f32 %v425_v23, %v345_v22 }
 0x22a   : > { %v435_v25 = vsel %vm434_vm4, %v426_v24, 0.0 }
 0x22b   : > { %436 = vadd.xlane.f32.xlu1 %v435_v25 }
 0x23c   : > { %349 = vperm.xlu1 %1814, %v341_v26  }
 0x240   : > { %1816 = vset.pattern.permute.xlu1 %v2071_v41 }
 0x241   : > { %506 = vperm.xlu1 %1816, %v2262_v10  }
 0x245   : > { %1817 = vset.pattern.permute.xlu1 %v2072_v42 }
 0x246   : > { %520 = vperm.xlu1 %1817, %v341_v26  }
 0x24a   : > { %516 = vperm.xlu1 %1817, %v2262_v10  }
 0x24e   : > { %1818 = vset.pattern.permute.xlu1 %v2070_v11 }
 0x2b4   : > { %v437_v27 = vpop.xlane.xlu1 %436 }
 0x2b5   : > { %v438_v28 = vrot.slane %v437_v27, 4 }
 0x2b7   : > { %v439_v29 = vadd.f32 %v438_v28, %v437_v27 }
 0x2b8   : > { %v350_v36 = vpop.permute.xlu1 %349 }
 0x2b9   : > { %v440_v30 = vrot.slane %v439_v29, 2  ;;  %v431_v38 = vadd.f32 %v1587_v21, %v350_v36 }
 0x2bb   : > { %v441_v31 = vadd.f32 %v440_v30, %v439_v29  ;;  %v470_v40 = vsel %vm434_vm4, %v431_v38, 0.0  ;;  %v566_v29 = vld [vmem:[#allocation5 + $0x10] sm:$0xff] }
 0x2bc   : > { %v507_v8 = vpop.permute.xlu1 %506  ;;  %1608 = vmatprep.mubr.msk.f32.mxu1 %vm352_vm3, %v566_v29  ;;  %v2305_v30 = vld [vmem:[#allocation7 + $0x10] sm:$0xff] }
 0x2bd   : > { %v442_v32 = vrot.slane %v441_v31, 1 }
 0x2bf   : > { %v443_v33 = vadd.f32 %v442_v32, %v441_v31 }
 0x2c1   : > { %1670 = vpush %v443_v33  ;;  %v521_v10 = vpop.permute.xlu1 %520 }
 0x2c5   : > { %v517_v18 = vpop.permute.xlu1 %516 }
 0x2f2   : > { %s1671_s17 = spop %1670 }
 0x2f3   : > { %s447_s12 = smul.f32 0.003787879, %s1671_s17 }
 0x2f5   : > { %v448_v34 = vstv %s447_s12 }
 0x2f6   : > { %v2275_v35 = vsub.f32 %v426_v24, %v448_v34 }
 0x2f8   : > { %v450_v37 = vmul.f32 %v2275_v35, %v2275_v35 }
 0x2fa   : > { %v451_v39 = vsel %vm434_vm4, %v450_v37, 0.0 }
 0x2fb   : > { %452 = vadd.xlane.f32.xlu0 %v451_v39  ;;  %v567_v39 = vld [vmem:[#allocation5 + $0x18] sm:$0xff] }
 0x2ff   : > { %471 = vadd.xlane.f32.xlu0 %v470_v40 }
 0x384   : > { %v453_v43 = vpop.xlane.xlu0 %452 }
 0x385   : > { %v454_v44 = vrot.slane %v453_v43, 4 }
 0x387   : > { %v455_v45 = vadd.f32 %v454_v44, %v453_v43 }
 0x388   : > { %v472_v50 = vpop.xlane.xlu0 %471 }
 0x389   : > { %v456_v46 = vrot.slane %v455_v45, 2  ;;  %v473_v51 = vrot.slane %v472_v50, 4 }
 0x38b   : > { %v457_v47 = vadd.f32 %v456_v46, %v455_v45  ;;  %v474_v52 = vadd.f32 %v473_v51, %v472_v50 }
 0x38d   : > { %v458_v48 = vrot.slane %v457_v47, 1  ;;  %v475_v54 = vrot.slane %v474_v52, 2 }
 0x38f   : > { %v459_v49 = vadd.f32 %v458_v48, %v457_v47  ;;  %v476_v55 = vadd.f32 %v475_v54, %v474_v52  ;;  %v570_v47 = vld [vmem:[#allocation7 + $0x18] sm:$0xff] }
 0x391   : > { %1672 = vpush %v459_v49  ;;  %v477_v56 = vrot.slane %v476_v55, 1 }
 0x393   : > { %v478_v58 = vadd.f32 %v477_v56, %v476_v55 }
 0x3c2   : > { %s1673_s8 = spop %1672 }
 0x3c3   : > { %s463_s10 = smul.f32 0.003787879, %s1673_s8 }
 0x3c5   : > { %s464_s9 = sadd.f32 1e-05, %s463_s10 }
 0x3c7   : > { %v465_v53 = vstv %s464_s9 }
 0x3c8   : > { %1832 = vrsqrt.f32 %v465_v53 }
 0x3d5   : > { %v1833_v57 = vpop.eup %1832 }
 0x3d6   : > { %1674 = vpush %v1833_v57 }
 0x3d7   : > { %1676 = vpush %v478_v58 }
 0x407   : > { %s1675_s11 = spop %1674 }
 0x408   : > { %s1677_s14 = spop %1676  ;;  %v468_v9 = vstv %s1675_s11 }
 0x409   : > { %s482_s27 = smul.f32 0.003787879, %s1677_s14  ;;  %v469_v12 = vmul.f32 %v468_v9, %v2275_v35 }
 0x40b   : > { %v483_v59 = vstv %s482_s27  ;;  %v513_v16 = vmul.f32 %v507_v8, %v469_v12 }
 0x40c   : > { %v484_v60 = vsub.f32 %v431_v38, %v483_v59 }
 0x40d   : > { %v523_v20 = vadd.f32 %v517_v18, %v513_v16 }
 0x40e   : > { %v485_v61 = vmul.f32 %v484_v60, %v484_v60 }
 0x40f   : > { %v525_v22 = vmax.f32 %v523_v20, 0.0 }
 0x410   : > { %v486_v62 = vsel %vm434_vm4, %v485_v61, 0.0 }
 0x411   : > { %487 = vadd.xlane.f32.xlu0 %v486_v62 }
 0x427   : > { %510 = vperm.xlu0 %1815, %v341_v26  }
 0x42b   : > { %1819 = vset.pattern.permute.xlu0 %v2070_v11 }
 0x49a   : > { %v488_v63 = vpop.xlane.xlu0 %487 }
 0x49b   : > { %v489_v0 = vrot.slane %v488_v63, 4 }
 0x49d   : > { %v490_v1 = vadd.f32 %v489_v0, %v488_v63 }
 0x49f   : > { %v491_v2 = vrot.slane %v490_v1, 2 }
 0x4a1   : > { %v492_v3 = vadd.f32 %v491_v2, %v490_v1 }
 0x4a2   : > { %v511_v14 = vpop.permute.xlu0 %510 }
 0x4a3   : > { %v493_v4 = vrot.slane %v492_v3, 1 }
 0x4a5   : > { %v494_v5 = vadd.f32 %v493_v4, %v492_v3 }
 0x4a7   : > { %1678 = vpush %v494_v5 }
 0x4d8   : > { %s1679_s30 = spop %1678 }
 0x4d9   : > { %s498_s29 = smul.f32 0.003787879, %s1679_s30 }
 0x4db   : > { %s499_s17 = sadd.f32 1e-05, %s498_s29 }
 0x4dd   : > { %v500_v6 = vstv %s499_s17  ;;  %s1482_s17 = sshll.u32 %s2233_s23, 3 }
 0x4de   : > { %1834 = vrsqrt.f32 %v500_v6 }
 0x4eb   : > { %v1835_v7 = vpop.eup %1834 }
 0x4ec   : > { %1680 = vpush %v1835_v7 }
 0x51d   : > { %s1681_s12 = spop %1680 }
 0x51e   : > { %v503_v13 = vstv %s1681_s12  ;;  %s2324_s12 = scalar_lea.vmem [#allocation11], %s1482_s17 }
 0x51f   : > { %v504_v15 = vmul.f32 %v503_v13, %v484_v60 }
 0x521   : > { %v514_v17 = vmul.f32 %v511_v14, %v504_v15 }
 0x523   : > { %v524_v19 = vadd.f32 %v521_v10, %v514_v17 }
 0x525   : > { %v526_v21 = vmax.f32 %v524_v19, 0.0 }
 0x527   : > { %531 = vrot.lane.b32.xlu1 %v526_v21, %s2065_s26 }
 0x52b   : > { %529 = vrot.lane.b32.xlu1 %v525_v22, %s2065_s26 }
 0x599   : > { %v532_v23 = vpop.permute.xlu1 %531 }
 0x59a   : > { %v536_v27 = vsel %vm306_vm1, 0.0, %v532_v23 }
 0x59b   : > { %v538_v28 = vsel %vm309_vm2, %v536_v27, 0.0 }
 0x59d   : > { %v530_v24 = vpop.permute.xlu1 %529 }
 0x59e   : > { %v535_v25 = vsel %vm306_vm1, 0.0, %v530_v24 }
 0x59f   : > { %v537_v26 = vsel %vm309_vm2, %v535_v25, 0.0 }
 0x5a0   : > { %547 = vrot.lane.b32.xlu0 %v537_v26, %s2068_s15  ;;  %559 = vrot.lane.b32.xlu1 %v537_v26, %s2067_s13 }
 0x5a4   : > { %541 = vrot.lane.b32.xlu0 %v537_v26, %s2069_s16  ;;  %553 = vrot.lane.b32.xlu1 %v537_v26, %s2066_s24 }
 0x5a8   : > { %561 = vrot.lane.b32.xlu1 %v538_v28, %s2067_s13 }
 0x5ac   : > { %555 = vrot.lane.b32.xlu1 %v538_v28, %s2066_s24 }
 0x5b0   : > { %549 = vrot.lane.b32.xlu1 %v538_v28, %s2068_s15 }
 0x5b4   : > { %543 = vrot.lane.b32.xlu1 %v538_v28, %s2069_s16 }
 0x5b8   : > { %573 = vperm.xlu1 %1818, %v2305_v30  }
 0x5bc   : > { %1820 = vset.pattern.permute.xlu1 %v2071_v41 }
 0x612   : > { %v560_v31 = vpop.permute.xlu1 %559  ;;  %v548_v35 = vpop.permute.xlu0 %547 }
 0x616   : > { %v554_v32 = vpop.permute.xlu1 %553  ;;  %v542_v38 = vpop.permute.xlu0 %541 }
 0x61a   : > { %v562_v33 = vpop.permute.xlu1 %561 }
 0x61b   : > { %1588 = vmatprep.subr.mxu1 %v562_v33 }
 0x61c   : > { %1589 = vmatpush3.msra.mxu1 %v562_v33 }
 0x61d   : > { %1590 = vmatprep.subr.mxu1 %v560_v31 }
 0x61e   : > { %1591 = vmatpush3.msra.mxu1 %v560_v31  ;;  %v556_v34 = vpop.permute.xlu1 %555 }
 0x61f   : > { %1592 = vmatprep.subr.mxu1 %v556_v34 }
 0x620   : > { %1593 = vmatpush3.msra.mxu1 %v556_v34 }
 0x621   : > { %1594 = vmatprep.subr.mxu1 %v554_v32 }
 0x622   : > { %1595 = vmatpush3.msra.mxu1 %v554_v32  ;;  %v550_v36 = vpop.permute.xlu1 %549 }
 0x623   : > { %1596 = vmatprep.subr.mxu1 %v550_v36 }
 0x624   : > { %1597 = vmatpush3.msra.mxu1 %v550_v36 }
 0x625   : > { %1598 = vmatprep.subr.mxu1 %v548_v35 }
 0x626   : > { %1599 = vmatpush3.msra.mxu1 %v548_v35  ;;  %v544_v37 = vpop.permute.xlu1 %543 }
 0x627   : > { %1600 = vmatprep.subr.mxu1 %v544_v37 }
 0x628   : > { %1601 = vmatpush3.msra.mxu1 %v544_v37 }
 0x629   : > { %1602 = vmatprep.subr.mxu1 %v542_v38 }
 0x62a   : > { %1603 = vmatpush3.msra.mxu1 %v542_v38 }
 0x62b   : > { %1604 = vmatprep.subr.msk.mxu1 %vm309_vm2, %v536_v27 }
 0x62c   : > { %1605 = vmatpush3.msk.msra.mxu1 %vm309_vm2, %v536_v27 }
 0x62d   : > { %1606 = vmatprep.subr.msk.mxu1 %vm309_vm2, %v535_v25 }
 0x62e   : > { %1607 = vmatpush3.msk.msra.mxu1 %vm309_vm2, %v535_v25 }
 0x62f   : > { %1609 = vmatmul.mubr.msk.f32.vlgmr.msra.gmra.mxu1 %vm352_vm3, %v567_v39 }
 0x633   : > { %v574_v43 = vpop.permute.xlu1 %573 }
 0x6ef   : > { %v1610_v40 = vpop.f32.mrf.mxu1 }
 0x6f1   : > { %v653_v44 = vpop.f32.mrf.mxu1 }
 0x6f2   : > { %v654_v45 = vadd.f32 %v653_v44, %v574_v43 }
 0x6f4   : > { %v662_v46 = vsel %vm434_vm4, %v654_v45, 0.0 }
 0x6f5   : > { %663 = vadd.xlane.f32.xlu0 %v662_v46 }
 0x70b   : > { %578 = vperm.xlu0 %1819, %v570_v47  }
 0x77e   : > { %v664_v48 = vpop.xlane.xlu0 %663 }
 0x77f   : > { %v665_v49 = vrot.slane %v664_v48, 4 }
 0x781   : > { %v666_v50 = vadd.f32 %v665_v49, %v664_v48 }
 0x783   : > { %v667_v51 = vrot.slane %v666_v50, 2 }
 0x785   : > { %v668_v52 = vadd.f32 %v667_v51, %v666_v50  ;;  %v794_v50 = vld [vmem:[#allocation5 + $0x20] sm:$0xff] }
 0x786   : > { %v579_v57 = vpop.permute.xlu0 %578  ;;  %1631 = vmatprep.mubr.msk.f32.mxu0 %vm352_vm3, %v794_v50  ;;  %v797_v51 = vld [vmem:[#allocation7 + $0x20] sm:$0xff] }
 0x787   : > { %v669_v53 = vrot.slane %v668_v52, 1  ;;  %v659_v59 = vadd.f32 %v1610_v40, %v579_v57 }
 0x789   : > { %v670_v54 = vadd.f32 %v669_v53, %v668_v52  ;;  %v697_v61 = vsel %vm434_vm4, %v659_v59, 0.0 }
 0x78b   : > { %1682 = vpush %v670_v54 }
 0x7bc   : > { %s1683_s8 = spop %1682 }
 0x7bd   : > { %s674_s10 = smul.f32 0.003787879, %s1683_s8 }
 0x7bf   : > { %v675_v55 = vstv %s674_s10 }
 0x7c0   : > { %v676_v56 = vsub.f32 %v654_v45, %v675_v55 }
 0x7c2   : > { %v677_v58 = vmul.f32 %v676_v56, %v676_v56 }
 0x7c4   : > { %v678_v60 = vsel %vm434_vm4, %v677_v58, 0.0 }
 0x7c5   : > { %679 = vadd.xlane.f32.xlu1 %v678_v60  ;;  %v795_v60 = vld [vmem:[#allocation5 + $0x28] sm:$0xff] }
 0x7c9   : > { %698 = vadd.xlane.f32.xlu1 %v697_v61 }
 0x84e   : > { %v680_v62 = vpop.xlane.xlu1 %679 }
 0x84f   : > { %v681_v63 = vrot.slane %v680_v62, 4 }
 0x851   : > { %v682_v0 = vadd.f32 %v681_v63, %v680_v62 }
 0x852   : > { %v699_v5 = vpop.xlane.xlu1 %698 }
 0x853   : > { %v683_v1 = vrot.slane %v682_v0, 2  ;;  %v700_v6 = vrot.slane %v699_v5, 4 }
 0x855   : > { %v684_v2 = vadd.f32 %v683_v1, %v682_v0  ;;  %v701_v7 = vadd.f32 %v700_v6, %v699_v5 }
 0x857   : > { %v685_v3 = vrot.slane %v684_v2, 1  ;;  %v702_v9 = vrot.slane %v701_v7, 2 }
 0x859   : > { %v686_v4 = vadd.f32 %v685_v3, %v684_v2  ;;  %v703_v10 = vadd.f32 %v702_v9, %v701_v7 }
 0x85b   : > { %1684 = vpush %v686_v4  ;;  %v704_v12 = vrot.slane %v703_v10, 1 }
 0x85d   : > { %v705_v14 = vadd.f32 %v704_v12, %v703_v10 }
 0x88c   : > { %s1685_s9 = spop %1684 }
 0x88d   : > { %s690_s11 = smul.f32 0.003787879, %s1685_s9 }
 0x88f   : > { %s691_s14 = sadd.f32 1e-05, %s690_s11 }
 0x891   : > { %v692_v8 = vstv %s691_s14 }
 0x892   : > { %1836 = vrsqrt.f32 %v692_v8 }
 0x89f   : > { %v1837_v13 = vpop.eup %1836 }
 0x8a0   : > { %1686 = vpush %v1837_v13 }
 0x8a1   : > { %1688 = vpush %v705_v14  ;;  %v798_v14 = vld [vmem:[#allocation7 + $0x28] sm:$0xff] }
 0x8d1   : > { %s1687_s27 = spop %1686 }
 0x8d2   : > { %s1689_s30 = spop %1688  ;;  %v695_v27 = vstv %s1687_s27 }
 0x8d3   : > { %s709_s29 = smul.f32 0.003787879, %s1689_s30  ;;  %v696_v31 = vmul.f32 %v695_v27, %v676_v56 }
 0x8d5   : > { %v710_v15 = vstv %s709_s29 }
 0x8d6   : > { %v711_v16 = vsub.f32 %v659_v59, %v710_v15 }
 0x8d8   : > { %v712_v17 = vmul.f32 %v711_v16, %v711_v16 }
 0x8da   : > { %v713_v18 = vsel %vm434_vm4, %v712_v17, 0.0 }
 0x8db   : > { %714 = vadd.xlane.f32.xlu1 %v713_v18 }
 0x8ec   : > { %737 = vperm.xlu1 %1820, %v570_v47  }
 0x8f0   : > { %733 = vperm.xlu1 %1820, %v2305_v30  }
 0x8f4   : > { %1821 = vset.pattern.permute.xlu1 %v2072_v42 }
 0x8f5   : > { %747 = vperm.xlu1 %1821, %v570_v47  }
 0x8f9   : > { %743 = vperm.xlu1 %1821, %v2305_v30  }
 0x8fd   : > { %1822 = vset.pattern.permute.xlu1 %v2071_v41 }
 0x964   : > { %v715_v19 = vpop.xlane.xlu1 %714 }
 0x965   : > { %v716_v20 = vrot.slane %v715_v19, 4 }
 0x967   : > { %v717_v21 = vadd.f32 %v716_v20, %v715_v19 }
 0x968   : > { %v738_v22 = vpop.permute.xlu1 %737 }
 0x969   : > { %v718_v23 = vrot.slane %v717_v21, 2 }
 0x96b   : > { %v719_v24 = vadd.f32 %v718_v23, %v717_v21 }
 0x96c   : > { %v734_v25 = vpop.permute.xlu1 %733 }
 0x96d   : > { %v720_v26 = vrot.slane %v719_v24, 1  ;;  %v740_v32 = vmul.f32 %v734_v25, %v696_v31 }
 0x96f   : > { %v721_v28 = vadd.f32 %v720_v26, %v719_v24 }
 0x970   : > { %v748_v29 = vpop.permute.xlu1 %747 }
 0x971   : > { %1690 = vpush %v721_v28 }
 0x974   : > { %v744_v33 = vpop.permute.xlu1 %743 }
 0x975   : > { %v750_v30 = vadd.f32 %v744_v33, %v740_v32 }
 0x977   : > { %v752_v34 = vmax.f32 %v750_v30, 0.0 }
 0x979   : > { %757 = vrot.lane.b32.xlu1 %v752_v34, %s2065_s26  ;;  %754 = vst.msk [vmem:[%s2324_s12] sm:$0xff] %vm434_vm4, %v752_v34 }
 0x9a2   : > { %s1691_s8 = spop %1690 }
 0x9a3   : > { %s725_s10 = smul.f32 0.003787879, %s1691_s8 }
 0x9a5   : > { %s726_s9 = sadd.f32 1e-05, %s725_s10 }
 0x9a7   : > { %v727_v35 = vstv %s726_s9 }
 0x9a8   : > { %1838 = vrsqrt.f32 %v727_v35 }
 0x9b5   : > { %v1839_v36 = vpop.eup %1838 }
 0x9b6   : > { %1692 = vpush %v1839_v36 }
 0x9e7   : > { %s1693_s11 = spop %1692 }
 0x9e8   : > { %v730_v37 = vstv %s1693_s11 }
 0x9e9   : > { %v731_v38 = vmul.f32 %v730_v37, %v711_v16 }
 0x9eb   : > { %v741_v39 = vmul.f32 %v738_v22, %v731_v38  ;;  %v758_v40 = vpop.permute.xlu1 %757 }
 0x9ec   : > { %v763_v43 = vsel %vm306_vm1, 0.0, %v758_v40 }
 0x9ed   : > { %v765_v44 = vsel %vm309_vm2, %v763_v43, 0.0  ;;  %v751_v45 = vadd.f32 %v748_v29, %v741_v39 }
 0x9ee   : > { %787 = vrot.lane.b32.xlu1 %v765_v44, %s2067_s13 }
 0x9ef   : > { %v753_v46 = vmax.f32 %v751_v45, 0.0 }
 0x9f1   : > { %759 = vrot.lane.b32.xlu0 %v753_v46, %s2065_s26 }
 0x9f2   : > { %781 = vrot.lane.b32.xlu1 %v765_v44, %s2066_s24 }
 0x9f6   : > { %775 = vrot.lane.b32.xlu1 %v765_v44, %s2068_s15 }
 0x9fa   : > { %769 = vrot.lane.b32.xlu1 %v765_v44, %s2069_s16 }
 0xa60   : > { %v788_v52 = vpop.permute.xlu1 %787 }
 0xa63   : > { %v760_v47 = vpop.permute.xlu0 %759 }
 0xa64   : > { %v764_v48 = vsel %vm306_vm1, 0.0, %v760_v47  ;;  %v782_v54 = vpop.permute.xlu1 %781 }
 0xa65   : > { %v766_v49 = vsel %vm309_vm2, %v764_v48, 0.0 }
 0xa66   : > { %789 = vrot.lane.b32.xlu0 %v766_v49, %s2067_s13 }
 0xa68   : > { %v776_v56 = vpop.permute.xlu1 %775 }
 0xa6a   : > { %783 = vrot.lane.b32.xlu0 %v766_v49, %s2066_s24 }
 0xa6c   : > { %v770_v59 = vpop.permute.xlu1 %769 }
 0xa6e   : > { %777 = vrot.lane.b32.xlu0 %v766_v49, %s2068_s15 }
 0xa72   : > { %771 = vrot.lane.b32.xlu0 %v766_v49, %s2069_s16 }
 0xa76   : > { %801 = vperm.xlu0 %1819, %v797_v51  }
 0xad8   : > { %v790_v53 = vpop.permute.xlu0 %789 }
 0xad9   : > { %1611 = vmatprep.subr.mxu0 %v790_v53 }
 0xada   : > { %1612 = vmatpush3.msra.mxu0 %v790_v53 }
 0xadb   : > { %1613 = vmatprep.subr.mxu0 %v788_v52 }
 0xadc   : > { %v784_v55 = vpop.permute.xlu0 %783  ;;  %1614 = vmatpush3.msra.mxu0 %v788_v52 }
 0xadd   : > { %1615 = vmatprep.subr.mxu0 %v784_v55 }
 0xade   : > { %1616 = vmatpush3.msra.mxu0 %v784_v55 }
 0xadf   : > { %1617 = vmatprep.subr.mxu0 %v782_v54 }
 0xae0   : > { %v778_v57 = vpop.permute.xlu0 %777  ;;  %1618 = vmatpush3.msra.mxu0 %v782_v54 }
 0xae1   : > { %1619 = vmatprep.subr.mxu0 %v778_v57 }
 0xae2   : > { %1620 = vmatpush3.msra.mxu0 %v778_v57 }
 0xae3   : > { %1621 = vmatprep.subr.mxu0 %v776_v56 }
 0xae4   : > { %v772_v58 = vpop.permute.xlu0 %771  ;;  %1622 = vmatpush3.msra.mxu0 %v776_v56 }
 0xae5   : > { %1623 = vmatprep.subr.mxu0 %v772_v58 }
 0xae6   : > { %1624 = vmatpush3.msra.mxu0 %v772_v58 }
 0xae7   : > { %1625 = vmatprep.subr.mxu0 %v770_v59 }
 0xae8   : > { %1626 = vmatpush3.msra.mxu0 %v770_v59 }
 0xae9   : > { %1627 = vmatprep.subr.msk.mxu0 %vm309_vm2, %v764_v48 }
 0xaea   : > { %1628 = vmatpush3.msk.msra.mxu0 %vm309_vm2, %v764_v48 }
 0xaeb   : > { %1629 = vmatprep.subr.msk.mxu0 %vm309_vm2, %v763_v43 }
 0xaec   : > { %1630 = vmatpush3.msk.msra.mxu0 %vm309_vm2, %v763_v43 }
 0xaed   : > { %1632 = vmatmul.mubr.msk.f32.vlgmr.msra.gmra.mxu0 %vm352_vm3, %v795_v60 }
 0xaf1   : > { %v802_v62 = vpop.permute.xlu0 %801 }
 0xbad   : > { %v1633_v61 = vpop.f32.mrf.mxu0 }
 0xbaf   : > { %v881_v63 = vpop.f32.mrf.mxu0 }
 0xbb0   : > { %v882_v0 = vadd.f32 %v881_v63, %v802_v62 }
 0xbb2   : > { %v890_v1 = vsel %vm434_vm4, %v882_v0, 0.0 }
 0xbb3   : > { %891 = vadd.xlane.f32.xlu1 %v890_v1 }
 0xc3c   : > { %v892_v2 = vpop.xlane.xlu1 %891 }
 0xc3d   : > { %v893_v3 = vrot.slane %v892_v2, 4 }
 0xc3f   : > { %v894_v4 = vadd.f32 %v893_v3, %v892_v2 }
 0xc41   : > { %v895_v5 = vrot.slane %v894_v4, 2 }
 0xc43   : > { %v896_v6 = vadd.f32 %v895_v5, %v894_v4  ;;  %v1021_v4 = vld [vmem:[#allocation5 + $0x30] sm:$0xff] }
 0xc44   : > { %1654 = vmatprep.mubr.msk.f32.mxu1 %vm352_vm3, %v1021_v4  ;;  %v2375_v5 = vld [vmem:[#allocation7 + $0x30] sm:$0xff] }
 0xc45   : > { %v897_v7 = vrot.slane %v896_v6, 1 }
 0xc47   : > { %v898_v8 = vadd.f32 %v897_v7, %v896_v6 }
 0xc49   : > { %1694 = vpush %v898_v8 }
 0xc7a   : > { %s1695_s14 = spop %1694 }
 0xc7b   : > { %s902_s27 = smul.f32 0.003787879, %s1695_s14 }
 0xc7d   : > { %v903_v9 = vstv %s902_s27 }
 0xc7e   : > { %v2348_v10 = vsub.f32 %v882_v0, %v903_v9 }
 0xc80   : > { %v905_v12 = vmul.f32 %v2348_v10, %v2348_v10 }
 0xc82   : > { %v906_v13 = vsel %vm434_vm4, %v905_v12, 0.0 }
 0xc83   : > { %907 = vadd.xlane.f32.xlu0 %v906_v13 }
 0xc99   : > { %806 = vperm.xlu0 %1819, %v798_v14  }
 0xc9d   : > { %1823 = vset.pattern.permute.xlu0 %v2071_v41 }
 0xc9e   : > { %961 = vperm.xlu0 %1823, %v797_v51  }
 0xca2   : > { %1825 = vset.pattern.permute.xlu0 %v2072_v42 }
 0xca3   : > { %971 = vperm.xlu0 %1825, %v797_v51  }
 0xca7   : > { %1826 = vset.pattern.permute.xlu0 %v2070_v11 }
 0xd0c   : > { %v908_v15 = vpop.xlane.xlu0 %907 }
 0xd0d   : > { %v909_v16 = vrot.slane %v908_v15, 4 }
 0xd0f   : > { %v910_v17 = vadd.f32 %v909_v16, %v908_v15  ;;  %v1022_v15 = vld [vmem:[#allocation5 + $0x38] sm:$0xff] }
 0xd11   : > { %v911_v18 = vrot.slane %v910_v17, 2 }
 0xd13   : > { %v912_v19 = vadd.f32 %v911_v18, %v910_v17 }
 0xd14   : > { %v807_v20 = vpop.permute.xlu0 %806 }
 0xd15   : > { %v887_v21 = vadd.f32 %v1633_v61, %v807_v20  ;;  %v913_v22 = vrot.slane %v912_v19, 1 }
 0xd17   : > { %v925_v23 = vsel %vm434_vm4, %v887_v21, 0.0  ;;  %v914_v24 = vadd.f32 %v913_v22, %v912_v19 }
 0xd18   : > { %926 = vadd.xlane.f32.xlu1 %v925_v23 }
 0xd19   : > { %1696 = vpush %v914_v24  ;;  %v962_v51 = vpop.permute.xlu0 %961 }
 0xd1e   : > { %v972_v57 = vpop.permute.xlu0 %971 }
 0xd4a   : > { %s1697_s30 = spop %1696 }
 0xd4b   : > { %s918_s29 = smul.f32 0.003787879, %s1697_s30 }
 0xd4d   : > { %s919_s17 = sadd.f32 1e-05, %s918_s29 }
 0xd4f   : > { %v920_v25 = vstv %s919_s17 }
 0xd50   : > { %1840 = vrsqrt.f32 %v920_v25 }
 0xd5d   : > { %v1841_v26 = vpop.eup %1840 }
 0xd5e   : > { %1698 = vpush %v1841_v26 }
 0xd8f   : > { %s1699_s8 = spop %1698 }
 0xd90   : > { %v923_v49 = vstv %s1699_s8 }
 0xda1   : > { %v927_v27 = vpop.xlane.xlu1 %926 }
 0xda2   : > { %v928_v28 = vrot.slane %v927_v27, 4 }
 0xda4   : > { %v929_v29 = vadd.f32 %v928_v28, %v927_v27 }
 0xda6   : > { %v930_v31 = vrot.slane %v929_v29, 2 }
 0xda8   : > { %v931_v32 = vadd.f32 %v930_v31, %v929_v29 }
 0xdaa   : > { %v932_v33 = vrot.slane %v931_v32, 1 }
 0xdac   : > { %v933_v30 = vadd.f32 %v932_v33, %v931_v32 }
 0xdae   : > { %1700 = vpush %v933_v30 }
 0xddf   : > { %s1701_s10 = spop %1700 }
 0xde0   : > { %s937_s9 = smul.f32 0.003787879, %s1701_s10 }
 0xde2   : > { %v938_v34 = vstv %s937_s9 }
 0xde3   : > { %v939_v35 = vsub.f32 %v887_v21, %v938_v34  ;;  %v1025_v21 = vld [vmem:[#allocation7 + $0x38] sm:$0xff] }
 0xde5   : > { %v940_v36 = vmul.f32 %v939_v35, %v939_v35 }
 0xde7   : > { %v941_v37 = vsel %vm434_vm4, %v940_v36, 0.0 }
 0xde8   : > { %942 = vadd.xlane.f32.xlu1 %v941_v37 }
 0xdf9   : > { %965 = vperm.xlu1 %1822, %v798_v14  }
 0xdfd   : > { %1824 = vset.pattern.permute.xlu1 %v2072_v42 }
 0xdfe   : > { %975 = vperm.xlu1 %1824, %v798_v14  }
 0xe02   : > { %1827 = vset.pattern.permute.xlu1 %v2070_v11  ;;  %v924_v11 = vmul.f32 %v923_v49, %v2348_v10 }
 0xe04   : > { %v968_v55 = vmul.f32 %v962_v51, %v924_v11 }
 0xe06   : > { %v978_v59 = vadd.f32 %v972_v57, %v968_v55 }
 0xe08   : > { %v980_v61 = vmax.f32 %v978_v59, 0.0  ;;  %v1213_v59 = vld [vmem:[#allocation8 + $0x20] sm:$0x1] }
 0xe09   : > { %1657 = vmatprep.subr.msk.mxu0 %vm1220_vm5, %v1213_v59 }
 0xe0a   : > { %1658 = vmatpush3.msk.msra.mxu0 %vm1220_vm5, %v1213_v59 }
 0xe71   : > { %v943_v38 = vpop.xlane.xlu1 %942 }
 0xe72   : > { %v944_v39 = vrot.slane %v943_v38, 4 }
 0xe74   : > { %v945_v40 = vadd.f32 %v944_v39, %v943_v38 }
 0xe75   : > { %v966_v50 = vpop.permute.xlu1 %965 }
 0xe76   : > { %v946_v43 = vrot.slane %v945_v40, 2 }
 0xe78   : > { %v947_v44 = vadd.f32 %v946_v43, %v945_v40 }
 0xe79   : > { %v976_v54 = vpop.permute.xlu1 %975 }
 0xe7a   : > { %v948_v45 = vrot.slane %v947_v44, 1 }
 0xe7c   : > { %v949_v46 = vadd.f32 %v948_v45, %v947_v44 }
 0xe7e   : > { %1702 = vpush %v949_v46 }
 0xeaf   : > { %s1703_s11 = spop %1702 }
 0xeb0   : > { %s953_s14 = smul.f32 0.003787879, %s1703_s11 }
 0xeb2   : > { %s954_s27 = sadd.f32 1e-05, %s953_s14 }
 0xeb4   : > { %v955_v47 = vstv %s954_s27  ;;  %s1506_s27 = sshll.u32 %s2128_s22, 7 }
 0xeb5   : > { %1842 = vrsqrt.f32 %v955_v47 }
 0xec2   : > { %v1843_v48 = vpop.eup %1842 }
 0xec3   : > { %1704 = vpush %v1843_v48 }
 0xef4   : > { %s1705_s30 = spop %1704 }
 0xef5   : > { %v958_v52 = vstv %s1705_s30 }
 0xef6   : > { %v959_v53 = vmul.f32 %v958_v52, %v939_v35 }
 0xef8   : > { %v969_v56 = vmul.f32 %v966_v50, %v959_v53 }
 0xefa   : > { %v979_v58 = vadd.f32 %v976_v54, %v969_v56 }
 0xefc   : > { %v981_v60 = vmax.f32 %v979_v58, 0.0 }
 0xefe   : > { %986 = vrot.lane.b32.xlu1 %v981_v60, %s2065_s26 }
 0xf02   : > { %984 = vrot.lane.b32.xlu1 %v980_v61, %s2065_s26 }
 0xf70   : > { %v987_v62 = vpop.permute.xlu1 %986 }
 0xf71   : > { %v991_v63 = vsel %vm306_vm1, 0.0, %v987_v62  ;;  %v1212_v62 = vld [vmem:[#allocation8 + $0x18] sm:$0xff] }
 0xf72   : > { %v993_v0 = vsel %vm309_vm2, %v991_v63, 0.0  ;;  %1659 = vmatprep.subr.mxu0 %v1212_v62 }
 0xf73   : > { %1016 = vrot.lane.b32.xlu0 %v993_v0, %s2067_s13  ;;  %1660 = vmatpush3.msra.mxu0 %v1212_v62 }
 0xf74   : > { %v985_v1 = vpop.permute.xlu1 %984 }
 0xf75   : > { %v990_v2 = vsel %vm306_vm1, 0.0, %v985_v1 }
 0xf76   : > { %v992_v3 = vsel %vm309_vm2, %v990_v2, 0.0 }
 0xf77   : > { %1010 = vrot.lane.b32.xlu0 %v993_v0, %s2066_s24  ;;  %1014 = vrot.lane.b32.xlu1 %v992_v3, %s2067_s13 }
 0xf7b   : > { %1004 = vrot.lane.b32.xlu0 %v993_v0, %s2068_s15  ;;  %1008 = vrot.lane.b32.xlu1 %v992_v3, %s2066_s24 }
 0xf7f   : > { %998 = vrot.lane.b32.xlu0 %v993_v0, %s2069_s16  ;;  %1002 = vrot.lane.b32.xlu1 %v992_v3, %s2068_s15  ;;  %v1211_v0 = vld [vmem:[#allocation8 + $0x10] sm:$0xff] }
 0xf80   : > { %1661 = vmatprep.subr.mxu0 %v1211_v0 }
 0xf81   : > { %1662 = vmatpush3.msra.mxu0 %v1211_v0 }
 0xf83   : > { %996 = vrot.lane.b32.xlu1 %v992_v3, %s2069_s16  ;;  %1028 = vperm.xlu0 %1826, %v2375_v5  }
 0xf87   : > { %1828 = vset.pattern.permute.xlu0 %v2071_v41 }
 0xfe5   : > { %v1017_v6 = vpop.permute.xlu0 %1016 }
 0xfe6   : > { %1634 = vmatprep.subr.mxu1 %v1017_v6 }
 0xfe7   : > { %1635 = vmatpush3.msra.mxu1 %v1017_v6 }
 0xfe9   : > { %v1015_v7 = vpop.permute.xlu1 %1014  ;;  %v1011_v8 = vpop.permute.xlu0 %1010 }
 0xfea   : > { %1636 = vmatprep.subr.mxu1 %v1015_v7 }
 0xfeb   : > { %1637 = vmatpush3.msra.mxu1 %v1015_v7  ;;  %v1209_v7 = vld [vmem:[#allocation8] sm:$0xff] }
 0xfec   : > { %1638 = vmatprep.subr.mxu1 %v1011_v8 }
 0xfed   : > { %v1009_v9 = vpop.permute.xlu1 %1008  ;;  %1639 = vmatpush3.msra.mxu1 %v1011_v8  ;;  %v1005_v10 = vpop.permute.xlu0 %1004 }
 0xfee   : > { %1640 = vmatprep.subr.mxu1 %v1009_v9 }
 0xfef   : > { %1641 = vmatpush3.msra.mxu1 %v1009_v9 }
 0xff0   : > { %1642 = vmatprep.subr.mxu1 %v1005_v10 }
 0xff1   : > { %v1003_v12 = vpop.permute.xlu1 %1002  ;;  %1643 = vmatpush3.msra.mxu1 %v1005_v10  ;;  %v999_v13 = vpop.permute.xlu0 %998 }
 0xff2   : > { %1644 = vmatprep.subr.mxu1 %v1003_v12 }
 0xff3   : > { %1645 = vmatpush3.msra.mxu1 %v1003_v12 }
 0xff4   : > { %1646 = vmatprep.subr.mxu1 %v999_v13 }
 0xff5   : > { %v997_v14 = vpop.permute.xlu1 %996  ;;  %1647 = vmatpush3.msra.mxu1 %v999_v13 }
 0xff6   : > { %1648 = vmatprep.subr.mxu1 %v997_v14 }
 0xff7   : > { %1649 = vmatpush3.msra.mxu1 %v997_v14 }
 0xff8   : > { %1650 = vmatprep.subr.msk.mxu1 %vm309_vm2, %v991_v63 }
 0xff9   : > { %1651 = vmatpush3.msk.msra.mxu1 %vm309_vm2, %v991_v63 }
 0xffa   : > { %1652 = vmatprep.subr.msk.mxu1 %vm309_vm2, %v990_v2 }
 0xffb   : > { %1653 = vmatpush3.msk.msra.mxu1 %vm309_vm2, %v990_v2 }
 0xffc   : > { %1655 = vmatmul.mubr.msk.f32.vlgmr.msra.gmra.mxu1 %vm352_vm3, %v1022_v15 }
 0xffe   : > { %v1029_v17 = vpop.permute.xlu0 %1028 }
0x10bc   : > { %v1656_v16 = vpop.f32.mrf.mxu1 }
0x10be   : > { %v1108_v18 = vpop.f32.mrf.mxu1 }
0x10bf   : > { %v1109_v19 = vadd.f32 %v1108_v18, %v1029_v17 }
0x10c1   : > { %v1117_v20 = vsel %vm434_vm4, %v1109_v19, 0.0 }
0x10c2   : > { %1118 = vadd.xlane.f32.xlu1 %v1117_v20 }
0x10d3   : > { %1033 = vperm.xlu1 %1827, %v1025_v21  }
0x10d7   : > { %1829 = vset.pattern.permute.xlu1 %v2071_v41 }
0x10d8   : > { %1192 = vperm.xlu1 %1829, %v1025_v21  }
0x10dc   : > { %1830 = vset.pattern.permute.xlu1 %v2072_v42 }
0x10dd   : > { %1198 = vperm.xlu1 %1830, %v2375_v5  }
0x10e1   : > { %1202 = vperm.xlu1 %1830, %v1025_v21  }
0x114b   : > { %v1119_v22 = vpop.xlane.xlu1 %1118 }
0x114c   : > { %v1120_v23 = vrot.slane %v1119_v22, 4 }
0x114e   : > { %v1121_v24 = vadd.f32 %v1120_v23, %v1119_v22 }
0x114f   : > { %v1034_v32 = vpop.permute.xlu1 %1033 }
0x1150   : > { %v1122_v25 = vrot.slane %v1121_v24, 2  ;;  %v1114_v33 = vadd.f32 %v1656_v16, %v1034_v32 }
0x1152   : > { %v1123_v26 = vadd.f32 %v1122_v25, %v1121_v24  ;;  %v1152_v34 = vsel %vm434_vm4, %v1114_v33, 0.0 }
0x1153   : > { %v1193_v58 = vpop.permute.xlu1 %1192 }
0x1154   : > { %v1124_v27 = vrot.slane %v1123_v26, 1 }
0x1156   : > { %v1125_v28 = vadd.f32 %v1124_v27, %v1123_v26 }
0x1158   : > { %1706 = vpush %v1125_v28  ;;  %v1199_v4 = vpop.permute.xlu1 %1198 }
0x115c   : > { %v1203_v17 = vpop.permute.xlu1 %1202 }
0x1189   : > { %s1707_s26 = spop %1706 }
0x118a   : > { %s1129_s24 = smul.f32 0.003787879, %s1707_s26 }
0x118c   : > { %v1130_v29 = vstv %s1129_s24  ;;  %s1335_s24 = scalar_lea.hbm %s2469_s5, %s1506_s27 }
0x118d   : > { %v1131_v31 = vsub.f32 %v1109_v19, %v1130_v29 }
0x118f   : > { %v1132_v41 = vmul.f32 %v1131_v31, %v1131_v31 }
0x1191   : > { %v1133_v30 = vsel %vm434_vm4, %v1132_v41, 0.0 }
0x1192   : > { %1134 = vadd.xlane.f32.xlu0 %v1133_v30 }
0x1196   : > { %1153 = vadd.xlane.f32.xlu0 %v1152_v34 }
0x121b   : > { %v1135_v35 = vpop.xlane.xlu0 %1134 }
0x121c   : > { %v1136_v36 = vrot.slane %v1135_v35, 4 }
0x121e   : > { %v1137_v37 = vadd.f32 %v1136_v36, %v1135_v35 }
0x121f   : > { %v1154_v44 = vpop.xlane.xlu0 %1153 }
0x1220   : > { %v1138_v38 = vrot.slane %v1137_v37, 2  ;;  %v1155_v45 = vrot.slane %v1154_v44, 4 }
0x1222   : > { %v1139_v39 = vadd.f32 %v1138_v38, %v1137_v37  ;;  %v1156_v46 = vadd.f32 %v1155_v45, %v1154_v44 }
0x1224   : > { %v1140_v40 = vrot.slane %v1139_v39, 1  ;;  %v1157_v48 = vrot.slane %v1156_v46, 2 }
0x1226   : > { %v1141_v43 = vadd.f32 %v1140_v40, %v1139_v39  ;;  %v1158_v49 = vadd.f32 %v1157_v48, %v1156_v46 }
0x1228   : > { %1708 = vpush %v1141_v43  ;;  %v1159_v50 = vrot.slane %v1158_v49, 1 }
0x122a   : > { %v1160_v11 = vadd.f32 %v1159_v50, %v1158_v49 }
0x1259   : > { %s1709_s13 = spop %1708 }
0x125a   : > { %s1145_s15 = smul.f32 0.003787879, %s1709_s13  ;;  %s1337_s13 = sshll.u32 %s2324_s12, 4  ;;  %s1338_s13 = int_to_ptr.vmem [resolvable:$true] %s1337_s13 }
0x125c   : > { %s1146_s16 = sadd.f32 1e-05, %s1145_s15  ;;  %s1308_s15 = scalar_lea.sflag [#allocation12], %s2233_s23 }
0x125e   : > { %v1147_v47 = vstv %s1146_s16  ;;  %s1954_s16 = scalar_lea.vmem %s1338_s13, 128 }
0x125f   : > { %1844 = vrsqrt.f32 %v1147_v47  ;;  %p1955_p4 = scmp.ne.s32.totalorder %s1338_s13, %s1954_s16 }
0x1261   : > { %p1956_p12 = pnand %p1955_p4, %p2487_p6 }
0x1263   : > { %p1957_p0 = pneg %p1956_p12 }
0x126c   : > { %v1845_v51 = vpop.eup %1844 }
0x126d   : > { %1710 = vpush %v1845_v51 }
0x126e   : > { %1712 = vpush %v1160_v11 }
0x129e   : > { %s1711_s29 = spop %1710 }
0x129f   : > { %s1713_s17 = spop %1712  ;;  %v1150_v61 = vstv %s1711_s29  ;;  %s2073_s29 = smov [#allocation11]  }
0x12a0   : > { %s1164_s8 = smul.f32 0.003787879, %s1713_s17  ;;  %v1151_v1 = vmul.f32 %v1150_v61, %v1131_v31  ;;  %s1958_s17 = sshll.u32 %s2073_s29, 4  ;;  %s1959_s17 = int_to_ptr.vmem [resolvable:$false] %s1958_s17 }
0x12a1   : > { %p1961_p5 = scmp.lt.s32.totalorder %s1338_s13, %s1959_s17 }
0x12a2   : > { %v1165_v52 = vstv %s1164_s8  ;;  %s1960_s8 = scalar_lea.vmem %s1959_s17, 256 }
0x12a3   : > { %v1166_v53 = vsub.f32 %v1114_v33, %v1165_v52  ;;  %p1962_p3 = scmp.lt.s32.totalorder %s1960_s8, %s1954_s16 }
0x12a5   : > { %v1167_v54 = vmul.f32 %v1166_v53, %v1166_v53  ;;  %p1963_p7 = por %p1962_p3, %p1961_p5 }
0x12a7   : > { %v1168_v55 = vsel %vm434_vm4, %v1167_v54, 0.0  ;;  %p1964_p9 = pnand %p1963_p7, %p1957_p0 }
0x12a8   : > { %1169 = vadd.xlane.f32.xlu0 %v1168_v55 }
0x12be   : > { %1188 = vperm.xlu0 %1828, %v2375_v5  }
0x12c2   : > { %1831 = vset.pattern.permute.xlu0 %v2072_v42  ;;  %v1210_v42 = vld [vmem:[#allocation8 + $0x8] sm:$0xff] }
0x12c3   : > { %1663 = vmatprep.subr.mxu0 %v1210_v42 }
0x12c4   : > { %1664 = vmatpush3.msra.mxu0 %v1210_v42 }
0x12c5   : > { %1665 = vmatprep.subr.mxu0 %v1209_v7 }
0x12c6   : > { %1666 = vmatpush3.msra.mxu0 %v1209_v7 }
0x1331   : > { %v1170_v56 = vpop.xlane.xlu0 %1169 }
0x1332   : > { %v1171_v57 = vrot.slane %v1170_v56, 4 }
0x1334   : > { %v1172_v60 = vadd.f32 %v1171_v57, %v1170_v56 }
0x1336   : > { %v1173_v63 = vrot.slane %v1172_v60, 2 }
0x1338   : > { %v1174_v2 = vadd.f32 %v1173_v63, %v1172_v60 }
0x1339   : > { %v1189_v3 = vpop.permute.xlu0 %1188 }
0x133a   : > { %v1195_v5 = vmul.f32 %v1189_v3, %v1151_v1  ;;  %v1175_v6 = vrot.slane %v1174_v2, 1 }
0x133c   : > { %v1205_v8 = vadd.f32 %v1199_v4, %v1195_v5  ;;  %v1176_v9 = vadd.f32 %v1175_v6, %v1174_v2 }
0x133e   : > { %v1207_v10 = vmax.f32 %v1205_v8, 0.0  ;;  %1714 = vpush %v1176_v9 }
0x1340   : > { %1667 = vmatprep.mubr.msk.f32.mxu0 %vm434_vm4, %v1207_v10 }
0x136f   : > { %s1715_s10 = spop %1714 }
0x1370   : > { %s1180_s9 = smul.f32 0.003787879, %s1715_s10 }
0x1372   : > { %s1181_s11 = sadd.f32 1e-05, %s1180_s9 }
0x1374   : > { %v1182_v12 = vstv %s1181_s11 }
0x1375   : > { %1846 = vrsqrt.f32 %v1182_v12 }
0x1382   : > { %v1847_v13 = vpop.eup %1846 }
0x1383   : > { %1716 = vpush %v1847_v13 }
0x13b4   : > { %s1717_s14 = spop %1716 }
0x13b5   : > { %v1185_v14 = vstv %s1717_s14 }
0x13b6   : > { %v1186_v15 = vmul.f32 %v1185_v14, %v1166_v53 }
0x13b8   : > { %v1196_v16 = vmul.f32 %v1193_v58, %v1186_v15 }
0x13ba   : > { %v1206_v18 = vadd.f32 %v1203_v17, %v1196_v16 }
0x13bc   : > { %v1208_v19 = vmax.f32 %v1206_v18, 0.0 }
0x13be   : > { %1668 = vmatmul.mubr.msk.f32.vlgmr.msra.gmra.mxu0 %vm434_vm4, %v1208_v19 }
0x13bf   : > { %1967 = shalt.err (!%p1964_p9)
}
0x13c0   : > { %s1968_s10 = scalar_lea.hbm %s1335_s24, 128  ;;  %s1972_s11 = scalar_lea.hbm %s2469_s5, 256 }
0x13c1   : > { %p1969_p13 = scmp.ne.s32.totalorder %s1335_s24, %s1968_s10  ;;  %p1973_p10 = scmp.lt.s32.totalorder %s1335_s24, %s2469_s5 }
0x13c2   : > { %p1974_p11 = scmp.lt.s32.totalorder %s1972_s11, %s1968_s10 }
0x13c3   : > { %p1970_p1 = pnand %p1969_p13, %p2487_p6 }
0x13c4   : > { %p1975_p2 = por %p1974_p11, %p1973_p10 }
0x13c5   : > { %p1971_p8 = pneg %p1970_p1 }
0x13c7   : > { %p1976_p4 = pnand %p1975_p2, %p1971_p8 }
0x13c9   : > { %1979 = shalt.err (!%p1976_p4)
}
0x13ca   : > { %1733 = dma.vmem_to_hbm [thread:$0]  (%p2487_p6), %s1338_s13, 128, %s1335_s24, %s1308_s15   ;;  %vm1299_vm6 = vcmask 138240  }
0x13cb   : > { %s1481_s30 = sshll.u32 %s2233_s23, 4  ;;  %s1509_s29 = sshll.u32 %s2128_s22, 8 }
0x13cc   : > { %s287_s26 = scalar_lea.vmem [#allocation10], %s1481_s30  ;;  %s2421_s10 = scalar_lea.hbm %s2468_s4, %s1509_s29 }
0x13cd   : > { %s1321_s16 = sshll.u32 %s287_s26, 4  ;;  %s1303_s24 = scalar_lea.sflag [#allocation4], %s2233_s23  ;;  %s2416_s16 = int_to_ptr.vmem [resolvable:$true] %s1321_s16 }
0x13ce   : > { %s1980_s13 = scalar_lea.vmem %s2416_s16, 256  ;;  %s2074_s22 = smov [#allocation10]  }
0x13cf   : > { %p1981_p12 = scmp.ne.s32.totalorder %s2416_s16, %s1980_s13  ;;  %s1984_s15 = sshll.u32 %s2074_s22, 4  ;;  %s1985_s15 = int_to_ptr.vmem [resolvable:$false] %s1984_s15 }
0x13d0   : > { %s1986_s12 = scalar_lea.vmem %s1985_s15, 512  ;;  %p1987_p3 = scmp.lt.s32.totalorder %s2416_s16, %s1985_s15 }
0x13d1   : > { %p1982_p0 = pnand %p1981_p12, %p2487_p6  ;;  %p1988_p7 = scmp.lt.s32.totalorder %s1986_s12, %s1980_s13 }
0x13d3   : > { %p1983_p5 = pneg %p1982_p0  ;;  %p1989_p9 = por %p1988_p7, %p1987_p3 }
0x13d5   : > { %p1990_p13 = pnand %p1989_p9, %p1983_p5 }
0x147e   : > { %v1669_v20 = vpop.f32.mrf.mxu0 }
0x147f   : > { %1301 = vst.msk [vmem:[%s287_s26 + $0x8] sm:$0xff] %vm1299_vm6, %v1669_v20 }
0x1480   : > { %v1290_v21 = vpop.f32.mrf.mxu0 }
0x1481   : > { %1300 = vst.msk [vmem:[%s287_s26] sm:$0xff] %vm1299_vm6, %v1290_v21 }
0x1482   : > { %1993 = shalt.err (!%p1990_p13)
}
0x1483   : > { %s1994_s9 = scalar_lea.hbm %s2421_s10, 256  ;;  %s1998_s27 = scalar_lea.hbm %s2468_s4, 512 }
0x1484   : > { %p1995_p1 = scmp.ne.s32.totalorder %s2421_s10, %s1994_s9  ;;  %p1999_p11 = scmp.lt.s32.totalorder %s2421_s10, %s2468_s4 }
0x1485   : > { %p2000_p2 = scmp.lt.s32.totalorder %s1998_s27, %s1994_s9 }
0x1486   : > { %p1996_p8 = pnand %p1995_p1, %p2487_p6 }
0x1487   : > { %p2001_p4 = por %p2000_p2, %p1999_p11 }
0x1488   : > { %p1997_p10 = pneg %p1996_p8 }
0x148a   : > { %p2002_p12 = pnand %p2001_p4, %p1997_p10 }
0x148c   : > { %2005 = shalt.err (!%p2002_p12)
}
0x148d   : > { %s2075_s29 = smov 128   ;;  %s2076_s17 = smov 8  }
0x148e   : > { %1732 = dma.vmem_to_hbm [thread:$0]  (%p2487_p6), %s2416_s16, 256, %s2421_s10, %s1303_s24, %s2075_s29, %s2075_s29, %s2076_s17  }
0x148f PF: > { %s1349_s8 = sand.u32 1, %s2044_s18   ;;  %p2488_p0 = scmp.ne.s32.totalorder %s2475_s25, 0 }
0x1490   : > { %p2489_p5 = scmp.ge.s32.totalorder %s2056_s21, 2  ;;  %s1350_s13 = scalar_lea.sflag [#allocation4], %s1349_s8 }
0x1492   : > { %p1751_p3 = pnand %p2489_p5, %p2488_p0 }
0x1494   : > { %p1752_p7 = pneg %p1751_p3 }
0x1496   : > { %2035 = dma.done.wait (%p1752_p7), %s1350_s13, 256  }
0x1497   : > { %2037 = vsyncadd (%p1752_p7), %s1350_s13, 4294967040  ;;  %s1359_s22 = scalar_lea.sflag [#allocation12], %s1349_s8 }
0x1498   : > { %2039 = dma.done.wait (%p1752_p7), %s1359_s22, 128  }
0x1499   : > { %2041 = vsyncadd (%p1752_p7), %s1359_s22, 4294967168  ;;  %p24_p6 = scmp.ge.s32.totalorder %s2187_s28, 4   ;;  %s2490_s18 = smov %s2048_s19 }
0x149a   : > { %s2491_s19 = smov %s2052_s20  ;;  %s2492_s20 = smov %s2197_s6 }
0x149b   : > { %s2493_s21 = smov %s2187_s28  ;;  %26 = sbr.rel (!%p24_p6) target bundleno = 9 (0x9), region = 116 }
0x14a0   :  { %1364 = vsyncpa [#allocation3], 1 }
0x14a1   :  { %1366 = vsyncpa [#allocation3 + $0x1], 1 }
0x14a2   :  { %1367 = vsyncpa [#allocation6], 1 }
0x14a3   :  { %1368 = vsyncpa [#allocation9], 1 }
0x14a4   :  { %1369 = vsyncpa [#allocation4], 1 }
0x14a5   :  { %1371 = vsyncpa [#allocation4 + $0x1], 1 }
0x14a6   :  { %1372 = vsyncpa [#allocation12], 1 }
0x14a7   :  { %1374 = vsyncpa [#allocation12 + $0x1], 1 }

</bundles_post_ra>
